<compile_context>
chip_gen: v7x
topology: tpu7x:2x2x1
jax: 0.10.0
libtpu: 0.0.40
codegen_flags: <defaults>
</compile_context>

<pallas_src>
import functools

import jax
import jax.numpy as jnp
from jax.experimental import pallas as pl
from jax.experimental.pallas import tpu as pltpu


def _round_up(a, b):
    return (a + b - 1) // b * b


def _swish(z, eup_dtype):
    """swish(z) = z*sigmoid(z) = 0.5*z*(1 + tanh(z/2)) — one EUP op per element.

    The tanh argument may be evaluated in bf16 (v6e/v7x) while all carried state
    stays f32.
    """
    half = 0.5 * z
    s = jnp.tanh(half.astype(eup_dtype)).astype(jnp.float32)
    return half * (1.0 + s)


def _default_eup_dtype():
    """bf16 transcendentals on v6e/v7x (2x EUP throughput); f32 elsewhere (v5e)."""
    try:
        kind = jax.devices()[0].device_kind.lower()
    except Exception:  # pragma: no cover
        return jnp.float32
    if "v6" in kind or "v7" in kind:
        return jnp.bfloat16
    return jnp.float32


def resnet_kernel(x_ref, w_in_ref, b_in_ref, w1_ref, b1_ref, w2_ref, b2_ref,
                  w_out_ref, b_out_ref, o_ref, *, eup_dtype):
    """Fused ResNet forward for one (TM, in_pad) tile of rows.

    Weights are bf16 in (in, out) layout (pre-transposed once), biases f32,
    elementwise math f32, matmul accumulation f32 via preferred_element_type.
    """
    num_blocks = w1_ref.shape[0]

    x = x_ref[...]  # bf16 (TM, in_pad)

    # input_proj: Linear(in_total -> D) + Swish  (padding cols of x / rows of W are 0)
    h = jnp.dot(x, w_in_ref[...], preferred_element_type=jnp.float32) + b_in_ref[...]
    h = _swish(h, eup_dtype)  # f32 (TM, D)

    # Residual blocks (dropout=0, no batch norm in the default config).
    for k in range(num_blocks):  # static unroll; weights already resident in VMEM
        u = jnp.dot(h.astype(jnp.bfloat16), w1_ref[k],
                    preferred_element_type=jnp.float32) + b1_ref[k]
        u = _swish(u, eup_dtype)
        v = jnp.dot(u.astype(jnp.bfloat16), w2_ref[k],
                    preferred_element_type=jnp.float32) + b2_ref[k]
        h = _swish(h + v, eup_dtype)

    # output_proj: Linear(D -> output_dim), written lane-dense into a 128-wide block.
    out = jnp.dot(h.astype(jnp.bfloat16), w_out_ref[...],
                  preferred_element_type=jnp.float32) + b_out_ref[...]
    o_ref[...] = out.astype(o_ref.dtype)


def prepare_params(params_f32):
    """One-time parameter prep (do at init, not per call).

    - Transpose PyTorch (out, in) weights to (in, out) so kernel matmuls are plain
      jnp.dot (predictable MXU lowering, no per-step relayout).
    - Cast weights to bf16 (MXU-native), keep biases f32, reshape for broadcast.
    - Zero-pad input rows of w_in to a multiple of 8 and output cols of
      w_out / b_out to a multiple of 128 (lane-dense output block).
    """
    d, in_total = params_f32["w_in"].shape            # (D, in_total)
    out_dim = params_f32["w_out"].shape[0]
    nb = params_f32["w1"].shape[0]
    in_pad = _round_up(in_total, 8)
    out_pad = _round_up(max(out_dim, 128), 128)

    w_in_t = jnp.zeros((in_pad, d), jnp.bfloat16)
    w_in_t = w_in_t.at[:in_total, :].set(params_f32["w_in"].T.astype(jnp.bfloat16))

    w_out_t = jnp.zeros((d, out_pad), jnp.bfloat16)
    w_out_t = w_out_t.at[:, :out_dim].set(params_f32["w_out"].T.astype(jnp.bfloat16))
    b_out_p = jnp.zeros((1, out_pad), jnp.float32)
    b_out_p = b_out_p.at[0, :out_dim].set(params_f32["b_out"].astype(jnp.float32))

    return {
        "w_in": w_in_t,                                               # (in_pad, D) bf16
        "b_in": params_f32["b_in"].reshape(1, d).astype(jnp.float32),
        "w1": jnp.transpose(params_f32["w1"], (0, 2, 1)).astype(jnp.bfloat16),  # (NB,D,D)
        "b1": params_f32["b1"].reshape(nb, 1, d).astype(jnp.float32),
        "w2": jnp.transpose(params_f32["w2"], (0, 2, 1)).astype(jnp.bfloat16),  # (NB,D,D)
        "b2": params_f32["b2"].reshape(nb, 1, d).astype(jnp.float32),
        "w_out": w_out_t,                                             # (D, out_pad) bf16
        "b_out": b_out_p,                                             # (1, out_pad) f32
    }


def resnet_forward(x, t, prepared_params, *, input_dim=2, time_dim=1,
                   output_dim=2, tm_max=2048, eup_dtype=None):
    """Mirrors ResNet.forward (dropout=0, use_batch_norm=False)."""
    kp = prepared_params
    if eup_dtype is None:
        eup_dtype = _default_eup_dtype()
    sz = x.shape
    in_pad = kp["w_in"].shape[0]
    out_pad = kp["w_out"].shape[1]

    # Flatten + optional time concat (mirrors the torch reshape/expand semantics).
    x2 = x.reshape(-1, input_dim).astype(jnp.float32)
    n = x2.shape[0]
    if t is not None:
        t2 = jnp.reshape(t, (-1, time_dim)).astype(jnp.float32)
        t2 = jnp.broadcast_to(jnp.reshape(t2, (-1, 1)), (n, 1))
        h = jnp.concatenate([x2, t2], axis=1)
    else:
        h = x2
    in_total = h.shape[1]
    if in_total < in_pad:
        h = jnp.pad(h, ((0, 0), (0, in_pad - in_total)))  # zero cols match zero W rows

    # Batch tile: large, multiple of 16 (bf16 sublane packing).
    tm_max = max(16, (tm_max // 16) * 16)
    tm = min(tm_max, _round_up(n, 16))
    if n >= 512:
        # Guarantee >= 2 grid steps so the "parallel" axis shards across both TCs on v7x.
        tm = min(tm, _round_up(pl.cdiv(n, 2), 16))
    tm = max(tm, 16)
    n_pad = _round_up(n, tm)
    if n_pad != n:
        h = jnp.pad(h, ((0, n_pad - n), (0, 0)))
    h_bf16 = h.astype(jnp.bfloat16)  # bf16 operands -> single-pass MXU matmuls

    grid = (n_pad // tm,)
    const2 = lambda i: (0, 0)
    const3 = lambda i: (0, 0, 0)

    out = pl.pallas_call(
        functools.partial(resnet_kernel, eup_dtype=eup_dtype),
        out_shape=jax.ShapeDtypeStruct((n_pad, out_pad), jnp.float32),
        grid=grid,
        in_specs=[
            pl.BlockSpec((tm, in_pad), lambda i: (i, 0)),   # x tile (pipelined)
            pl.BlockSpec(kp["w_in"].shape, const2),          # resident weights
            pl.BlockSpec(kp["b_in"].shape, const2),
            pl.BlockSpec(kp["w1"].shape, const3),
            pl.BlockSpec(kp["b1"].shape, const3),
            pl.BlockSpec(kp["w2"].shape, const3),
            pl.BlockSpec(kp["b2"].shape, const3),
            pl.BlockSpec(kp["w_out"].shape, const2),
            pl.BlockSpec(kp["b_out"].shape, const2),
        ],
        out_specs=pl.BlockSpec((tm, out_pad), lambda i: (i, 0)),  # lane-dense (128-wide)
        compiler_params=pltpu.CompilerParams(
            dimension_semantics=("parallel",),      # batch tiles shard across TCs (v7x)
            vmem_limit_bytes=48 * 1024 * 1024,      # explicit budget, < v7x 64 MiB/TC
        ),
    )(h_bf16, kp["w_in"], kp["b_in"], kp["w1"], kp["b1"], kp["w2"], kp["b2"],
      kp["w_out"], kp["b_out"])

    out = out[:n, :output_dim]
    if output_dim == input_dim:
        return out.reshape(sz)
    return out.reshape(sz[0], output_dim)


def resnet_ref(x, t, params_f32, *, input_dim=2, output_dim=2,
               matmul_dtype=jnp.float32, tanh_swish=False, eup_dtype=jnp.float32):
    """Pure-JAX reference mirroring the PyTorch forward.

    matmul_dtype=bf16 + tanh_swish=True + matching eup_dtype mimics the kernel's
    numerics (bf16 operands, f32 accumulation, single-tanh swish)."""
    sz = x.shape
    x2 = x.reshape(-1, input_dim).astype(jnp.float32)
    n = x2.shape[0]
    if t is not None:
        t2 = jnp.reshape(t, (-1, 1)).astype(jnp.float32)
        t2 = jnp.broadcast_to(t2, (n, 1))
        h = jnp.concatenate([x2, t2], axis=1)
    else:
        h = x2

    def lin(a, w, b):
        return jnp.dot(a.astype(matmul_dtype), w.T.astype(matmul_dtype),
                       preferred_element_type=jnp.float32) + b

    def sw(z):
        if tanh_swish:
            return _swish(z, eup_dtype)
        return jax.nn.sigmoid(z) * z

    h = sw(lin(h, params_f32["w_in"], params_f32["b_in"]))
    for k in range(params_f32["w1"].shape[0]):
        u = sw(lin(h, params_f32["w1"][k], params_f32["b1"][k]))
        v = lin(u, params_f32["w2"][k], params_f32["b2"][k])
        h = sw(h + v)
    out = lin(h, params_f32["w_out"], params_f32["b_out"])
    if output_dim == input_dim:
        return out.reshape(sz)
    return out.reshape(sz[0], output_dim)


if __name__ == "__main__":
    key = jax.random.PRNGKey(0)

    # Module defaults: input_dim=2, time_dim=1, hidden_dim=128, num_blocks=4.
    INPUT_DIM, TIME_DIM, HIDDEN_DIM, NUM_BLOCKS = 2, 1, 128, 4
    OUTPUT_DIM = INPUT_DIM
    in_total = INPUT_DIM + TIME_DIM

    keys = jax.random.split(key, 12)

    def uinit(k, shape, fan_in):
        bound = 1.0 / (fan_in ** 0.5)
        return jax.random.uniform(k, shape, minval=-bound, maxval=bound,
                                  dtype=jnp.float32)

    params = {
        "w_in": uinit(keys[0], (HIDDEN_DIM, in_total), in_total),     # torch (out, in)
        "b_in": uinit(keys[1], (HIDDEN_DIM,), in_total),
        "w1": uinit(keys[2], (NUM_BLOCKS, HIDDEN_DIM, HIDDEN_DIM), HIDDEN_DIM),
        "b1": uinit(keys[3], (NUM_BLOCKS, HIDDEN_DIM), HIDDEN_DIM),
        "w2": uinit(keys[4], (NUM_BLOCKS, HIDDEN_DIM, HIDDEN_DIM), HIDDEN_DIM),
        "b2": uinit(keys[5], (NUM_BLOCKS, HIDDEN_DIM), HIDDEN_DIM),
        "w_out": uinit(keys[6], (OUTPUT_DIM, HIDDEN_DIM), HIDDEN_DIM),
        "b_out": uinit(keys[7], (OUTPUT_DIM,), HIDDEN_DIM),
    }
    prepared = prepare_params(params)  # one-time transpose/pad/bf16 cast
    eup_dtype = _default_eup_dtype()

    def check(B, tm_max):
        x = jax.random.normal(keys[8], (B, INPUT_DIM), dtype=jnp.float32)
        t = jax.random.uniform(keys[9], (B,), dtype=jnp.float32)
        out = jax.block_until_ready(
            resnet_forward(x, t, prepared, input_dim=INPUT_DIM, time_dim=TIME_DIM,
                           output_dim=OUTPUT_DIM, tm_max=tm_max, eup_dtype=eup_dtype))
        assert out.shape == (B, OUTPUT_DIM)
        # Matched-precision reference (bf16 operands, f32 acc, same swish form/dtype).
        ref_m = resnet_ref(x, t, params, input_dim=INPUT_DIM, output_dim=OUTPUT_DIM,
                           matmul_dtype=jnp.bfloat16, tanh_swish=True,
                           eup_dtype=eup_dtype)
        # Full-f32 sigmoid-form reference (loose sanity check).
        ref_f = resnet_ref(x, t, params, input_dim=INPUT_DIM, output_dim=OUTPUT_DIM,
                           matmul_dtype=jnp.float32, tanh_swish=False)
        assert jnp.allclose(out, ref_m, atol=2e-2, rtol=2e-2), \
            "mismatch vs matched-precision reference"
        assert jnp.allclose(out, ref_f, atol=1.5e-1, rtol=1.5e-1), \
            "mismatch vs f32 reference (sanity)"

    # Default config: single large tile (small demo batch fits in one grid step).
    check(B=48, tm_max=2048)
    # Multi-step grid + row-padding coverage (correctness only; production keeps
    # tm_max at its large default).
    check(B=300, tm_max=128)

    print("KERNEL_OK")
</pallas_src>

<mosaic_0001>
module attributes {stable_mosaic.version = 11 : i64} {
  func.func @resnet_kernel(%arg0: i32, %arg1: memref<48x8xbf16, #tpu.memory_space<vmem>>, %arg2: memref<8x128xbf16, #tpu.memory_space<vmem>>, %arg3: memref<1x128xf32, #tpu.memory_space<vmem>>, %arg4: memref<4x128x128xbf16, #tpu.memory_space<vmem>>, %arg5: memref<4x1x128xf32, #tpu.memory_space<vmem>>, %arg6: memref<4x128x128xbf16, #tpu.memory_space<vmem>>, %arg7: memref<4x1x128xf32, #tpu.memory_space<vmem>>, %arg8: memref<128x128xbf16, #tpu.memory_space<vmem>>, %arg9: memref<1x128xf32, #tpu.memory_space<vmem>>, %arg10: memref<48x128xf32, #tpu.memory_space<vmem>>) attributes {dimension_semantics = [#tpu.dimension_semantics<parallel>], iteration_bounds = array<i64: 1>, scalar_prefetch = 0 : i64, scratch_operands = 0 : i64, tpu.core_type = #tpu.core_type<tc>, window_params = [{transform_indices = @transform_0, window_bounds = array<i64: 48, 8>}, {pipeline_mode = #tpu.pipeline_mode<synchronous>, transform_indices = @transform_1, window_bounds = array<i64: 8, 128>}, {pipeline_mode = #tpu.pipeline_mode<synchronous>, transform_indices = @transform_2, window_bounds = array<i64: 1, 128>}, {pipeline_mode = #tpu.pipeline_mode<synchronous>, transform_indices = @transform_3, window_bounds = array<i64: 4, 128, 128>}, {pipeline_mode = #tpu.pipeline_mode<synchronous>, transform_indices = @transform_4, window_bounds = array<i64: 4, 1, 128>}, {pipeline_mode = #tpu.pipeline_mode<synchronous>, transform_indices = @transform_5, window_bounds = array<i64: 4, 128, 128>}, {pipeline_mode = #tpu.pipeline_mode<synchronous>, transform_indices = @transform_6, window_bounds = array<i64: 4, 1, 128>}, {pipeline_mode = #tpu.pipeline_mode<synchronous>, transform_indices = @transform_7, window_bounds = array<i64: 128, 128>}, {pipeline_mode = #tpu.pipeline_mode<synchronous>, transform_indices = @transform_8, window_bounds = array<i64: 1, 128>}, {transform_indices = @transform_9, window_bounds = array<i64: 48, 128>}]} {
    %c0 = arith.constant 0 : index
    %c0_0 = arith.constant 0 : index
    %0 = vector.load %arg1[%c0, %c0_0] : memref<48x8xbf16, #tpu.memory_space<vmem>>, vector<48x8xbf16>
    %c0_1 = arith.constant 0 : index
    %c0_2 = arith.constant 0 : index
    %1 = vector.load %arg2[%c0_1, %c0_2] : memref<8x128xbf16, #tpu.memory_space<vmem>>, vector<8x128xbf16>
    %cst = arith.constant dense<0.000000e+00> : vector<48x128xf32>
    %2 = tpu.matmul %0, %1, %cst {dimension_numbers = #tpu.dot_dimension_numbers<[1], [0], [0], [1], [0, 0, 1, 1], [], []>} : vector<48x8xbf16>, vector<8x128xbf16>, vector<48x128xf32> -> vector<48x128xf32>
    %c0_3 = arith.constant 0 : index
    %c0_4 = arith.constant 0 : index
    %3 = vector.load %arg3[%c0_3, %c0_4] : memref<1x128xf32, #tpu.memory_space<vmem>>, vector<1x128xf32>
    %4 = vector.broadcast %3 : vector<1x128xf32> to vector<48x128xf32>
    %5 = arith.addf %2, %4 : vector<48x128xf32>
    %cst_5 = arith.constant 5.000000e-01 : f32
    %6 = vector.broadcast %cst_5 : f32 to vector<48x128xf32>
    %7 = arith.mulf %6, %5 : vector<48x128xf32>
    %8 = math.tanh %7 : vector<48x128xf32>
    %cst_6 = arith.constant 1.000000e+00 : f32
    %9 = vector.broadcast %cst_6 : f32 to vector<48x128xf32>
    %10 = arith.addf %9, %8 : vector<48x128xf32>
    %11 = arith.mulf %7, %10 : vector<48x128xf32>
    %12 = arith.truncf %11 : vector<48x128xf32> to vector<48x128xbf16>
    %c0_7 = arith.constant 0 : index
    %c0_8 = arith.constant 0 : index
    %c0_9 = arith.constant 0 : index
    %13 = vector.load %arg4[%c0_7, %c0_8, %c0_9] : memref<4x128x128xbf16, #tpu.memory_space<vmem>>, vector<1x128x128xbf16>
    %14 = vector.shape_cast %13 : vector<1x128x128xbf16> to vector<128x128xbf16>
    %cst_10 = arith.constant dense<0.000000e+00> : vector<48x128xf32>
    %15 = tpu.matmul %12, %14, %cst_10 {dimension_numbers = #tpu.dot_dimension_numbers<[1], [0], [0], [1], [0, 0, 1, 1], [], []>} : vector<48x128xbf16>, vector<128x128xbf16>, vector<48x128xf32> -> vector<48x128xf32>
    %c0_11 = arith.constant 0 : index
    %c0_12 = arith.constant 0 : index
    %c0_13 = arith.constant 0 : index
    %16 = vector.load %arg5[%c0_11, %c0_12, %c0_13] : memref<4x1x128xf32, #tpu.memory_space<vmem>>, vector<1x1x128xf32>
    %17 = vector.shape_cast %16 : vector<1x1x128xf32> to vector<1x128xf32>
    %18 = vector.broadcast %17 : vector<1x128xf32> to vector<48x128xf32>
    %19 = arith.addf %15, %18 : vector<48x128xf32>
    %cst_14 = arith.constant 5.000000e-01 : f32
    %20 = vector.broadcast %cst_14 : f32 to vector<48x128xf32>
    %21 = arith.mulf %20, %19 : vector<48x128xf32>
    %22 = math.tanh %21 : vector<48x128xf32>
    %cst_15 = arith.constant 1.000000e+00 : f32
    %23 = vector.broadcast %cst_15 : f32 to vector<48x128xf32>
    %24 = arith.addf %23, %22 : vector<48x128xf32>
    %25 = arith.mulf %21, %24 : vector<48x128xf32>
    %26 = arith.truncf %25 : vector<48x128xf32> to vector<48x128xbf16>
    %c0_16 = arith.constant 0 : index
    %c0_17 = arith.constant 0 : index
    %c0_18 = arith.constant 0 : index
    %27 = vector.load %arg6[%c0_16, %c0_17, %c0_18] : memref<4x128x128xbf16, #tpu.memory_space<vmem>>, vector<1x128x128xbf16>
    %28 = vector.shape_cast %27 : vector<1x128x128xbf16> to vector<128x128xbf16>
    %cst_19 = arith.constant dense<0.000000e+00> : vector<48x128xf32>
    %29 = tpu.matmul %26, %28, %cst_19 {dimension_numbers = #tpu.dot_dimension_numbers<[1], [0], [0], [1], [0, 0, 1, 1], [], []>} : vector<48x128xbf16>, vector<128x128xbf16>, vector<48x128xf32> -> vector<48x128xf32>
    %c0_20 = arith.constant 0 : index
    %c0_21 = arith.constant 0 : index
    %c0_22 = arith.constant 0 : index
    %30 = vector.load %arg7[%c0_20, %c0_21, %c0_22] : memref<4x1x128xf32, #tpu.memory_space<vmem>>, vector<1x1x128xf32>
    %31 = vector.shape_cast %30 : vector<1x1x128xf32> to vector<1x128xf32>
    %32 = vector.broadcast %31 : vector<1x128xf32> to vector<48x128xf32>
    %33 = arith.addf %29, %32 : vector<48x128xf32>
    %34 = arith.addf %11, %33 : vector<48x128xf32>
    %cst_23 = arith.constant 5.000000e-01 : f32
    %35 = vector.broadcast %cst_23 : f32 to vector<48x128xf32>
    %36 = arith.mulf %35, %34 : vector<48x128xf32>
    %37 = math.tanh %36 : vector<48x128xf32>
    %cst_24 = arith.constant 1.000000e+00 : f32
    %38 = vector.broadcast %cst_24 : f32 to vector<48x128xf32>
    %39 = arith.addf %38, %37 : vector<48x128xf32>
    %40 = arith.mulf %36, %39 : vector<48x128xf32>
    %41 = arith.truncf %40 : vector<48x128xf32> to vector<48x128xbf16>
    %c1 = arith.constant 1 : index
    %c0_25 = arith.constant 0 : index
    %c0_26 = arith.constant 0 : index
    %42 = vector.load %arg4[%c1, %c0_25, %c0_26] : memref<4x128x128xbf16, #tpu.memory_space<vmem>>, vector<1x128x128xbf16>
    %43 = vector.shape_cast %42 : vector<1x128x128xbf16> to vector<128x128xbf16>
    %cst_27 = arith.constant dense<0.000000e+00> : vector<48x128xf32>
    %44 = tpu.matmul %41, %43, %cst_27 {dimension_numbers = #tpu.dot_dimension_numbers<[1], [0], [0], [1], [0, 0, 1, 1], [], []>} : vector<48x128xbf16>, vector<128x128xbf16>, vector<48x128xf32> -> vector<48x128xf32>
    %c1_28 = arith.constant 1 : index
    %c0_29 = arith.constant 0 : index
    %c0_30 = arith.constant 0 : index
    %45 = vector.load %arg5[%c1_28, %c0_29, %c0_30] : memref<4x1x128xf32, #tpu.memory_space<vmem>>, vector<1x1x128xf32>
    %46 = vector.shape_cast %45 : vector<1x1x128xf32> to vector<1x128xf32>
    %47 = vector.broadcast %46 : vector<1x128xf32> to vector<48x128xf32>
    %48 = arith.addf %44, %47 : vector<48x128xf32>
    %cst_31 = arith.constant 5.000000e-01 : f32
    %49 = vector.broadcast %cst_31 : f32 to vector<48x128xf32>
    %50 = arith.mulf %49, %48 : vector<48x128xf32>
    %51 = math.tanh %50 : vector<48x128xf32>
    %cst_32 = arith.constant 1.000000e+00 : f32
    %52 = vector.broadcast %cst_32 : f32 to vector<48x128xf32>
    %53 = arith.addf %52, %51 : vector<48x128xf32>
    %54 = arith.mulf %50, %53 : vector<48x128xf32>
    %55 = arith.truncf %54 : vector<48x128xf32> to vector<48x128xbf16>
    %c1_33 = arith.constant 1 : index
    %c0_34 = arith.constant 0 : index
    %c0_35 = arith.constant 0 : index
    %56 = vector.load %arg6[%c1_33, %c0_34, %c0_35] : memref<4x128x128xbf16, #tpu.memory_space<vmem>>, vector<1x128x128xbf16>
    %57 = vector.shape_cast %56 : vector<1x128x128xbf16> to vector<128x128xbf16>
    %cst_36 = arith.constant dense<0.000000e+00> : vector<48x128xf32>
    %58 = tpu.matmul %55, %57, %cst_36 {dimension_numbers = #tpu.dot_dimension_numbers<[1], [0], [0], [1], [0, 0, 1, 1], [], []>} : vector<48x128xbf16>, vector<128x128xbf16>, vector<48x128xf32> -> vector<48x128xf32>
    %c1_37 = arith.constant 1 : index
    %c0_38 = arith.constant 0 : index
    %c0_39 = arith.constant 0 : index
    %59 = vector.load %arg7[%c1_37, %c0_38, %c0_39] : memref<4x1x128xf32, #tpu.memory_space<vmem>>, vector<1x1x128xf32>
    %60 = vector.shape_cast %59 : vector<1x1x128xf32> to vector<1x128xf32>
    %61 = vector.broadcast %60 : vector<1x128xf32> to vector<48x128xf32>
    %62 = arith.addf %58, %61 : vector<48x128xf32>
    %63 = arith.addf %40, %62 : vector<48x128xf32>
    %cst_40 = arith.constant 5.000000e-01 : f32
    %64 = vector.broadcast %cst_40 : f32 to vector<48x128xf32>
    %65 = arith.mulf %64, %63 : vector<48x128xf32>
    %66 = math.tanh %65 : vector<48x128xf32>
    %cst_41 = arith.constant 1.000000e+00 : f32
    %67 = vector.broadcast %cst_41 : f32 to vector<48x128xf32>
    %68 = arith.addf %67, %66 : vector<48x128xf32>
    %69 = arith.mulf %65, %68 : vector<48x128xf32>
    %70 = arith.truncf %69 : vector<48x128xf32> to vector<48x128xbf16>
    %c2 = arith.constant 2 : index
    %c0_42 = arith.constant 0 : index
    %c0_43 = arith.constant 0 : index
    %71 = vector.load %arg4[%c2, %c0_42, %c0_43] : memref<4x128x128xbf16, #tpu.memory_space<vmem>>, vector<1x128x128xbf16>
    %72 = vector.shape_cast %71 : vector<1x128x128xbf16> to vector<128x128xbf16>
    %cst_44 = arith.constant dense<0.000000e+00> : vector<48x128xf32>
    %73 = tpu.matmul %70, %72, %cst_44 {dimension_numbers = #tpu.dot_dimension_numbers<[1], [0], [0], [1], [0, 0, 1, 1], [], []>} : vector<48x128xbf16>, vector<128x128xbf16>, vector<48x128xf32> -> vector<48x128xf32>
    %c2_45 = arith.constant 2 : index
    %c0_46 = arith.constant 0 : index
    %c0_47 = arith.constant 0 : index
    %74 = vector.load %arg5[%c2_45, %c0_46, %c0_47] : memref<4x1x128xf32, #tpu.memory_space<vmem>>, vector<1x1x128xf32>
    %75 = vector.shape_cast %74 : vector<1x1x128xf32> to vector<1x128xf32>
    %76 = vector.broadcast %75 : vector<1x128xf32> to vector<48x128xf32>
    %77 = arith.addf %73, %76 : vector<48x128xf32>
    %cst_48 = arith.constant 5.000000e-01 : f32
    %78 = vector.broadcast %cst_48 : f32 to vector<48x128xf32>
    %79 = arith.mulf %78, %77 : vector<48x128xf32>
    %80 = math.tanh %79 : vector<48x128xf32>
    %cst_49 = arith.constant 1.000000e+00 : f32
    %81 = vector.broadcast %cst_49 : f32 to vector<48x128xf32>
    %82 = arith.addf %81, %80 : vector<48x128xf32>
    %83 = arith.mulf %79, %82 : vector<48x128xf32>
    %84 = arith.truncf %83 : vector<48x128xf32> to vector<48x128xbf16>
    %c2_50 = arith.constant 2 : index
    %c0_51 = arith.constant 0 : index
    %c0_52 = arith.constant 0 : index
    %85 = vector.load %arg6[%c2_50, %c0_51, %c0_52] : memref<4x128x128xbf16, #tpu.memory_space<vmem>>, vector<1x128x128xbf16>
    %86 = vector.shape_cast %85 : vector<1x128x128xbf16> to vector<128x128xbf16>
    %cst_53 = arith.constant dense<0.000000e+00> : vector<48x128xf32>
    %87 = tpu.matmul %84, %86, %cst_53 {dimension_numbers = #tpu.dot_dimension_numbers<[1], [0], [0], [1], [0, 0, 1, 1], [], []>} : vector<48x128xbf16>, vector<128x128xbf16>, vector<48x128xf32> -> vector<48x128xf32>
    %c2_54 = arith.constant 2 : index
    %c0_55 = arith.constant 0 : index
    %c0_56 = arith.constant 0 : index
    %88 = vector.load %arg7[%c2_54, %c0_55, %c0_56] : memref<4x1x128xf32, #tpu.memory_space<vmem>>, vector<1x1x128xf32>
    %89 = vector.shape_cast %88 : vector<1x1x128xf32> to vector<1x128xf32>
    %90 = vector.broadcast %89 : vector<1x128xf32> to vector<48x128xf32>
    %91 = arith.addf %87, %90 : vector<48x128xf32>
    %92 = arith.addf %69, %91 : vector<48x128xf32>
    %cst_57 = arith.constant 5.000000e-01 : f32
    %93 = vector.broadcast %cst_57 : f32 to vector<48x128xf32>
    %94 = arith.mulf %93, %92 : vector<48x128xf32>
    %95 = math.tanh %94 : vector<48x128xf32>
    %cst_58 = arith.constant 1.000000e+00 : f32
    %96 = vector.broadcast %cst_58 : f32 to vector<48x128xf32>
    %97 = arith.addf %96, %95 : vector<48x128xf32>
    %98 = arith.mulf %94, %97 : vector<48x128xf32>
    %99 = arith.truncf %98 : vector<48x128xf32> to vector<48x128xbf16>
    %c3 = arith.constant 3 : index
    %c0_59 = arith.constant 0 : index
    %c0_60 = arith.constant 0 : index
    %100 = vector.load %arg4[%c3, %c0_59, %c0_60] : memref<4x128x128xbf16, #tpu.memory_space<vmem>>, vector<1x128x128xbf16>
    %101 = vector.shape_cast %100 : vector<1x128x128xbf16> to vector<128x128xbf16>
    %cst_61 = arith.constant dense<0.000000e+00> : vector<48x128xf32>
    %102 = tpu.matmul %99, %101, %cst_61 {dimension_numbers = #tpu.dot_dimension_numbers<[1], [0], [0], [1], [0, 0, 1, 1], [], []>} : vector<48x128xbf16>, vector<128x128xbf16>, vector<48x128xf32> -> vector<48x128xf32>
    %c3_62 = arith.constant 3 : index
    %c0_63 = arith.constant 0 : index
    %c0_64 = arith.constant 0 : index
    %103 = vector.load %arg5[%c3_62, %c0_63, %c0_64] : memref<4x1x128xf32, #tpu.memory_space<vmem>>, vector<1x1x128xf32>
    %104 = vector.shape_cast %103 : vector<1x1x128xf32> to vector<1x128xf32>
    %105 = vector.broadcast %104 : vector<1x128xf32> to vector<48x128xf32>
    %106 = arith.addf %102, %105 : vector<48x128xf32>
    %cst_65 = arith.constant 5.000000e-01 : f32
    %107 = vector.broadcast %cst_65 : f32 to vector<48x128xf32>
    %108 = arith.mulf %107, %106 : vector<48x128xf32>
    %109 = math.tanh %108 : vector<48x128xf32>
    %cst_66 = arith.constant 1.000000e+00 : f32
    %110 = vector.broadcast %cst_66 : f32 to vector<48x128xf32>
    %111 = arith.addf %110, %109 : vector<48x128xf32>
    %112 = arith.mulf %108, %111 : vector<48x128xf32>
    %113 = arith.truncf %112 : vector<48x128xf32> to vector<48x128xbf16>
    %c3_67 = arith.constant 3 : index
    %c0_68 = arith.constant 0 : index
    %c0_69 = arith.constant 0 : index
    %114 = vector.load %arg6[%c3_67, %c0_68, %c0_69] : memref<4x128x128xbf16, #tpu.memory_space<vmem>>, vector<1x128x128xbf16>
    %115 = vector.shape_cast %114 : vector<1x128x128xbf16> to vector<128x128xbf16>
    %cst_70 = arith.constant dense<0.000000e+00> : vector<48x128xf32>
    %116 = tpu.matmul %113, %115, %cst_70 {dimension_numbers = #tpu.dot_dimension_numbers<[1], [0], [0], [1], [0, 0, 1, 1], [], []>} : vector<48x128xbf16>, vector<128x128xbf16>, vector<48x128xf32> -> vector<48x128xf32>
    %c3_71 = arith.constant 3 : index
    %c0_72 = arith.constant 0 : index
    %c0_73 = arith.constant 0 : index
    %117 = vector.load %arg7[%c3_71, %c0_72, %c0_73] : memref<4x1x128xf32, #tpu.memory_space<vmem>>, vector<1x1x128xf32>
    %118 = vector.shape_cast %117 : vector<1x1x128xf32> to vector<1x128xf32>
    %119 = vector.broadcast %118 : vector<1x128xf32> to vector<48x128xf32>
    %120 = arith.addf %116, %119 : vector<48x128xf32>
    %121 = arith.addf %98, %120 : vector<48x128xf32>
    %cst_74 = arith.constant 5.000000e-01 : f32
    %122 = vector.broadcast %cst_74 : f32 to vector<48x128xf32>
    %123 = arith.mulf %122, %121 : vector<48x128xf32>
    %124 = math.tanh %123 : vector<48x128xf32>
    %cst_75 = arith.constant 1.000000e+00 : f32
    %125 = vector.broadcast %cst_75 : f32 to vector<48x128xf32>
    %126 = arith.addf %125, %124 : vector<48x128xf32>
    %127 = arith.mulf %123, %126 : vector<48x128xf32>
    %128 = arith.truncf %127 : vector<48x128xf32> to vector<48x128xbf16>
    %c0_76 = arith.constant 0 : index
    %c0_77 = arith.constant 0 : index
    %129 = vector.load %arg8[%c0_76, %c0_77] : memref<128x128xbf16, #tpu.memory_space<vmem>>, vector<128x128xbf16>
    %cst_78 = arith.constant dense<0.000000e+00> : vector<48x128xf32>
    %130 = tpu.matmul %128, %129, %cst_78 {dimension_numbers = #tpu.dot_dimension_numbers<[1], [0], [0], [1], [0, 0, 1, 1], [], []>} : vector<48x128xbf16>, vector<128x128xbf16>, vector<48x128xf32> -> vector<48x128xf32>
    %c0_79 = arith.constant 0 : index
    %c0_80 = arith.constant 0 : index
    %131 = vector.load %arg9[%c0_79, %c0_80] : memref<1x128xf32, #tpu.memory_space<vmem>>, vector<1x128xf32>
    %132 = vector.broadcast %131 : vector<1x128xf32> to vector<48x128xf32>
    %133 = arith.addf %130, %132 : vector<48x128xf32>
    %c0_81 = arith.constant 0 : index
    %c0_82 = arith.constant 0 : index
    %134 = vector.load %arg10[%c0_81, %c0_82] : memref<48x128xf32, #tpu.memory_space<vmem>>, vector<48x128xf32>
    tpu.vector_store %arg10[%c0_81, %c0_82], %133 {strides = array<i32>} : memref<48x128xf32, #tpu.memory_space<vmem>>, vector<48x128xf32>,
    return
  }
  func.func @transform_0(%arg0: i32) -> (i32, i32) {
    %c0_i32 = arith.constant 0 : i32
    %c0_i32_0 = arith.constant 0 : i32
    return %arg0, %c0_i32 : i32, i32
  }
  func.func @transform_1(%arg0: i32) -> (i32, i32) {
    %c0_i32 = arith.constant 0 : i32
    %c0_i32_0 = arith.constant 0 : i32
    %c0_i32_1 = arith.constant 0 : i32
    return %c0_i32, %c0_i32_0 : i32, i32
  }
  func.func @transform_2(%arg0: i32) -> (i32, i32) {
    %c0_i32 = arith.constant 0 : i32
    %c0_i32_0 = arith.constant 0 : i32
    %c0_i32_1 = arith.constant 0 : i32
    return %c0_i32, %c0_i32_0 : i32, i32
  }
  func.func @transform_3(%arg0: i32) -> (i32, i32, i32) {
    %c0_i32 = arith.constant 0 : i32
    %c0_i32_0 = arith.constant 0 : i32
    %c0_i32_1 = arith.constant 0 : i32
    %c0_i32_2 = arith.constant 0 : i32
    return %c0_i32, %c0_i32_0, %c0_i32_1 : i32, i32, i32
  }
  func.func @transform_4(%arg0: i32) -> (i32, i32, i32) {
    %c0_i32 = arith.constant 0 : i32
    %c0_i32_0 = arith.constant 0 : i32
    %c0_i32_1 = arith.constant 0 : i32
    %c0_i32_2 = arith.constant 0 : i32
    return %c0_i32, %c0_i32_0, %c0_i32_1 : i32, i32, i32
  }
  func.func @transform_5(%arg0: i32) -> (i32, i32, i32) {
    %c0_i32 = arith.constant 0 : i32
    %c0_i32_0 = arith.constant 0 : i32
    %c0_i32_1 = arith.constant 0 : i32
    %c0_i32_2 = arith.constant 0 : i32
    return %c0_i32, %c0_i32_0, %c0_i32_1 : i32, i32, i32
  }
  func.func @transform_6(%arg0: i32) -> (i32, i32, i32) {
    %c0_i32 = arith.constant 0 : i32
    %c0_i32_0 = arith.constant 0 : i32
    %c0_i32_1 = arith.constant 0 : i32
    %c0_i32_2 = arith.constant 0 : i32
    return %c0_i32, %c0_i32_0, %c0_i32_1 : i32, i32, i32
  }
  func.func @transform_7(%arg0: i32) -> (i32, i32) {
    %c0_i32 = arith.constant 0 : i32
    %c0_i32_0 = arith.constant 0 : i32
    %c0_i32_1 = arith.constant 0 : i32
    return %c0_i32, %c0_i32_0 : i32, i32
  }
  func.func @transform_8(%arg0: i32) -> (i32, i32) {
    %c0_i32 = arith.constant 0 : i32
    %c0_i32_0 = arith.constant 0 : i32
    %c0_i32_1 = arith.constant 0 : i32
    return %c0_i32, %c0_i32_0 : i32, i32
  }
  func.func @transform_9(%arg0: i32) -> (i32, i32) {
    %c0_i32 = arith.constant 0 : i32
    %c0_i32_0 = arith.constant 0 : i32
    return %arg0, %c0_i32 : i32, i32
  }
}

</mosaic_0001>

<bundles_post_ra>
// kernel: tpu_custom_call.1
= control target key start
LH: loop header
LB: loop body
LE: loop exit
PB: predicated region body
PF: predicated region fallthrough
CT: control target
= control target key end

     0   :  { %14 = vsyncpa [#allocation3], 0  ;;  %s2799_s0 = inlined_call_operand.vmem [shape: bf16[48,8], index: 0, kind: input, shape index: {}]   ;;  %s2800_s1 = inlined_call_operand.vmem [shape: bf16[8,128], index: 1, kind: input, shape index: {}]   ;;  %s2801_s2 = inlined_call_operand.vmem [shape: f32[1,128], index: 2, kind: input, shape index: {}]   ;;  %s2802_s3 = inlined_call_operand.hbm [shape: bf16[4,128,128], index: 3, kind: input, shape index: {}]   ;;  %s2803_s4 = inlined_call_operand.vmem [shape: f32[4,1,128], index: 4, kind: input, shape index: {}]   ;;  %s2804_s5 = inlined_call_operand.hbm [shape: bf16[4,128,128], index: 5, kind: input, shape index: {}]   ;;  %s2805_s6 = inlined_call_operand.vmem [shape: f32[4,1,128], index: 6, kind: input, shape index: {}]   ;;  %s2806_s7 = inlined_call_operand.hbm [shape: bf16[128,128], index: 7, kind: input, shape index: {}]   ;;  %s2807_s8 = inlined_call_operand.vmem [shape: f32[1,128], index: 8, kind: input, shape index: {}]   ;;  %s2808_s9 = inlined_call_operand.hbm [shape: f32[48,128], index: 9, kind: output, shape index: {}]  }
   0x1   :  { %15 = vsyncpa [#allocation6], 0 }
   0x2   :  { %16 = vsyncpa [#allocation4], 0  ;;  %s2396_s30 = smov [#allocation5]   ;;  %s2397_s11 = smov [#allocation2]  }
   0x3   :  { %s42_s10 = sshll.u32 %s2396_s30, 4  ;;  %s28_s12 = sshll.u32 %s2397_s11, 4  ;;  %s43_s10 = int_to_ptr.vmem [resolvable:$true] %s42_s10  ;;  %s2456_s12 = int_to_ptr.vmem [resolvable:$true] %s28_s12 }
   0x4   :  { %s2302_s15 = scalar_lea.hbm %s2804_s5, 4096 }
   0x5   :  { %p2303_p0 = scmp.ne.s32.totalorder %s2804_s5, %s2302_s15  ;;  %p2306_p1 = scmp.lt.u32.totalorder %s2302_s15, %s2804_s5 }
   0x7   :  { %p2308_p2 = pnand %p2306_p1, %p2303_p0 }
   0x9   :  { %2311 = shalt.err (!%p2308_p2)
}
   0xa   :  { %s2312_s20 = scalar_lea.vmem %s43_s10, 4096  ;;  %p2317_p4 = scmp.lt.s32.totalorder %s43_s10, %s43_s10 }
   0xb   :  { %p2313_p3 = scmp.ne.s32.totalorder %s43_s10, %s2312_s20  ;;  %p2318_p5 = scmp.lt.s32.totalorder %s2312_s20, %s2312_s20 }
   0xd   :  { %p2319_p6 = por %p2318_p5, %p2317_p4 }
   0xf   :  { %p2320_p7 = pnand %p2319_p6, %p2313_p3 }
  0x11   :  { %2323 = shalt.err (!%p2320_p7)
}
  0x12   :  { %s2398_s21 = smov 64   ;;  %s2399_s22 = smov 4  }
  0x13   :  { %48 = dma.hbm_to_vmem [thread:$0]  %s2804_s5, 4096, %s43_s10, [#allocation6], %s2398_s21, %s2398_s21, %s2399_s22  }
  0x14   :  { %s2324_s27 = scalar_lea.hbm %s2802_s3, 4096 }
  0x15   :  { %p2325_p8 = scmp.ne.s32.totalorder %s2802_s3, %s2324_s27  ;;  %p2328_p9 = scmp.lt.u32.totalorder %s2324_s27, %s2802_s3 }
  0x17   :  { %p2330_p10 = pnand %p2328_p9, %p2325_p8 }
  0x19   :  { %2333 = shalt.err (!%p2330_p10)
}
  0x1a   :  { %s2334_s13 = scalar_lea.vmem %s2456_s12, 4096  ;;  %p2339_p12 = scmp.lt.s32.totalorder %s2456_s12, %s2456_s12 }
  0x1b   :  { %p2335_p11 = scmp.ne.s32.totalorder %s2456_s12, %s2334_s13  ;;  %p2340_p13 = scmp.lt.s32.totalorder %s2334_s13, %s2334_s13 }
  0x1d   :  { %p2341_p0 = por %p2340_p13, %p2339_p12 }
  0x1f   :  { %p2342_p1 = pnand %p2341_p0, %p2335_p11 }
  0x21   :  { %2345 = shalt.err (!%p2342_p1)
}
  0x22   :  { %34 = dma.hbm_to_vmem [thread:$0]  %s2802_s3, 4096, %s2456_s12, [#allocation3], %s2398_s21, %s2398_s21, %s2399_s22  }
  0x23   :  { %s2400_s14 = smov [#allocation7]   ;;  %s2346_s18 = scalar_lea.hbm %s2806_s7, 1024 }
  0x24   :  { %s56_s15 = sshll.u32 %s2400_s14, 4  ;;  %p2347_p2 = scmp.ne.s32.totalorder %s2806_s7, %s2346_s18  ;;  %s57_s15 = int_to_ptr.vmem [resolvable:$true] %s56_s15 }
  0x25   :  { %p2350_p3 = scmp.lt.u32.totalorder %s2346_s18, %s2806_s7 }
  0x27   :  { %p2352_p4 = pnand %p2350_p3, %p2347_p2 }
  0x29   :  { %2355 = shalt.err (!%p2352_p4)
}
  0x2a   :  { %s2356_s25 = scalar_lea.vmem %s57_s15, 1024  ;;  %p2361_p6 = scmp.lt.s32.totalorder %s57_s15, %s57_s15 }
  0x2b   :  { %p2357_p5 = scmp.ne.s32.totalorder %s57_s15, %s2356_s25  ;;  %p2362_p7 = scmp.lt.s32.totalorder %s2356_s25, %s2356_s25 }
  0x2d   :  { %p2363_p8 = por %p2362_p7, %p2361_p6 }
  0x2f   :  { %p2364_p9 = pnand %p2363_p8, %p2357_p5 }
  0x31   :  { %2367 = shalt.err (!%p2364_p9)
}
  0x32   :  { %62 = dma.hbm_to_vmem [thread:$0]  %s2806_s7, 1024, %s57_s15, [#allocation6], %s2398_s21, %s2398_s21, %s2399_s22  }
  0x33   :  { %2390 = dma.done.wait [#allocation3], 4096  }
  0x34   :  { %2391 = vsyncadd [#allocation3], 4294963200 }
  0x35   :  { %2392 = dma.done.wait [#allocation6], 5120  }
  0x36   :  { %2393 = vsyncadd [#allocation6], 4294962176  ;;  %v2401_v0 = vmov 0.0   ;;  %vm2402_vm0 = vmmov 0   ;;  %vm114_vm1 = vcmask 1043456   ;;  %v2119_v3 = vld [vmem:[%s2799_s0] sm:$0xff]  }
  0x37   :  { %1827 = vmatprep.subr.bf16.mxu0 %v2401_v0  ;;  %1829 = vmatprep.mubr.msk.bf16.mxu0 %vm2402_vm0, %v2401_v0  ;;  %v81_v1 = vld [vmem:[%s2800_s1] sm:$0xf]  ;;  %vm104_vm2 = vcmask 64512   ;;  %v2122_v4 = vld [vmem:[#allocation2] sm:$0xff]   ;;  %v2123_v5 = vld [vmem:[#allocation2 + $0x8] sm:$0xff]   ;;  %s2403_s12 = smov [#allocation8]  }
  0x38   :  { %1841 = vmatprep.subr.bf16.mxu1 %v2401_v0  ;;  %1857 = vmatprep.mubr.msk.bf16.mxu1 %vm2402_vm0, %v2401_v0  ;;  %v116_v2 = vsel %vm114_vm1, %v81_v1, 0  ;;  %v2120_v6 = vld [vmem:[%s2799_s0 + $0x8] sm:$0xff]   ;;  %v2121_v7 = vld [vmem:[%s2799_s0 + $0x10] sm:$0xff]   ;;  %v2124_v8 = vld [vmem:[#allocation2 + $0x10] sm:$0xff]   ;;  %s1617_s26 = sshll.u32 %s2403_s12, 4  ;;  %s1618_s26 = int_to_ptr.vmem [resolvable:$true] %s1617_s26 }
  0x39   :  { %1828 = vmatpush3.bf16.msra.mxu0 %v116_v2  ;;  %1842 = vmatpush3.bf16.msra.mxu1 %v2122_v4  ;;  %v2125_v9 = vld [vmem:[#allocation2 + $0x18] sm:$0xff]   ;;  %v2126_v10 = vld [vmem:[#allocation2 + $0x20] sm:$0xff]   ;;  %v2127_v11 = vld [vmem:[#allocation2 + $0x28] sm:$0xff]   ;;  %p2373_p11 = scmp.lt.s32.totalorder %s1618_s26, %s1618_s26 }
  0x3a   :  { %1869 = vmatprep.subr.bf16.mxu0 %v2401_v0  ;;  %1843 = vmatprep.subr.bf16.mxu1 %v2401_v0  ;;  %v2128_v12 = vld [vmem:[#allocation2 + $0x30] sm:$0xff]   ;;  %v2129_v13 = vld [vmem:[#allocation2 + $0x38] sm:$0xff]   ;;  %v2130_v14 = vld [vmem:[#allocation5] sm:$0xff]  }
  0x3b   :  { %v2131_v15 = vld [vmem:[#allocation5 + $0x8] sm:$0xff]   ;;  %v1630_v16 = vld [vmem:[%s2801_s2] ss:$0 sm:$0xff]  ;;  %v2133_v63 = vld [vmem:[#allocation5 + $0x18] sm:$0xff]  }
  0x3c   :  { %1830 = vmatmul.mubr.msk.bf16.vlgmr.msra.gmra.mrb[0].mxu0 %vm104_vm2, %v2119_v3  ;;  %v2132_v62 = vld [vmem:[#allocation5 + $0x10] sm:$0xff]   ;;  %v2134_v1 = vld [vmem:[#allocation5 + $0x20] sm:$0xff]   ;;  %v2135_v2 = vld [vmem:[#allocation5 + $0x28] sm:$0xff]  }
  0x3d   :  { %1833 = vmatprep.mubr.msk.bf16.mxu0 %vm2402_vm0, %v2401_v0  ;;  %1844 = vmatpush3.bf16.msra.mxu1 %v2123_v5  ;;  %v2136_v3 = vld [vmem:[#allocation5 + $0x30] sm:$0xff]   ;;  %v2137_v4 = vld [vmem:[#allocation5 + $0x38] sm:$0xff]   ;;  %v2138_v5 = vld [vmem:[#allocation2 + $0x40] sm:$0xff]  }
  0x3e   :  { %1845 = vmatprep.subr.bf16.mxu1 %v2401_v0  ;;  %1870 = vmatpush3.bf16.msra.mxu0 %v2130_v14 }
  0x3f   :  { %1871 = vmatprep.subr.bf16.mxu0 %v2401_v0 }
  0x41   :  { %1846 = vmatpush3.bf16.msra.mxu1 %v2124_v8 }
  0x42   :  { %1847 = vmatprep.subr.bf16.mxu1 %v2401_v0  ;;  %1872 = vmatpush3.bf16.msra.mxu0 %v2131_v15 }
  0x43   :  { %1873 = vmatprep.subr.bf16.mxu0 %v2401_v0 }
  0x44   :  { %1834 = vmatmul.mubr.msk.bf16.gmra.mrb[4].mxu0 %vm104_vm2, %v2120_v6  ;;  %v2139_v6 = vld [vmem:[#allocation2 + $0x48] sm:$0xff]  }
  0x45   :  { %1837 = vmatprep.mubr.msk.bf16.mxu0 %vm2402_vm0, %v2401_v0  ;;  %1848 = vmatpush3.bf16.msra.mxu1 %v2125_v9 }
  0x46   :  { %1849 = vmatprep.subr.bf16.mxu1 %v2401_v0  ;;  %1874 = vmatpush3.bf16.msra.mxu0 %v2132_v62  ;;  %v2143_v62 = vld [vmem:[#allocation2 + $0x68] sm:$0xff]  }
  0x47   :  { %1875 = vmatprep.subr.bf16.mxu0 %v2401_v0 }
  0x49   :  { %1850 = vmatpush3.bf16.msra.mxu1 %v2126_v10 }
  0x4a   :  { %1851 = vmatprep.subr.bf16.mxu1 %v2401_v0  ;;  %1876 = vmatpush3.bf16.msra.mxu0 %v2133_v63  ;;  %v2144_v63 = vld [vmem:[#allocation2 + $0x70] sm:$0xff]  }
  0x4b   :  { %1877 = vmatprep.subr.bf16.mxu0 %v2401_v0 }
  0x4c   :  { %1838 = vmatmul.mubr.msk.bf16.gmra.mrb[8].mxu0 %vm104_vm2, %v2121_v7  ;;  %v1637_v7 = vld [vmem:[%s2803_s4] ss:$0 sm:$0xff] }
  0x4d   :  { %1885 = vmatprep.mubr.msk.bf16.mxu0 %vm2402_vm0, %v2401_v0  ;;  %1852 = vmatpush3.bf16.msra.mxu1 %v2127_v11 }
  0x4e   :  { %1853 = vmatprep.subr.bf16.mxu1 %v2401_v0  ;;  %1878 = vmatpush3.bf16.msra.mxu0 %v2134_v1  ;;  %v2145_v1 = vld [vmem:[#allocation2 + $0x78] sm:$0xff]  }
  0x4f   :  { %1879 = vmatprep.subr.bf16.mxu0 %v2401_v0 }
  0x51   :  { %1854 = vmatpush3.bf16.msra.mxu1 %v2128_v12 }
  0x52   :  { %1855 = vmatprep.subr.bf16.mxu1 %v2401_v0  ;;  %1880 = vmatpush3.bf16.msra.mxu0 %v2135_v2  ;;  %v2146_v2 = vld [vmem:[#allocation5 + $0x40] sm:$0xff]  }
  0x53   :  { %1881 = vmatprep.subr.bf16.mxu0 %v2401_v0 }
  0x55   :  { %1856 = vmatpush3.bf16.msra.mxu1 %v2129_v13 }
  0x56   :  { %1897 = vmatprep.subr.bf16.mxu1 %v2401_v0  ;;  %1882 = vmatpush3.bf16.msra.mxu0 %v2136_v3  ;;  %v2147_v3 = vld [vmem:[#allocation5 + $0x48] sm:$0xff]  }
  0x57   :  { %1883 = vmatprep.subr.bf16.mxu0 %v2401_v0 }
  0x5a   :  { %1884 = vmatpush3.bf16.msra.mxu0 %v2137_v4  ;;  %v1646_v4 = vld [vmem:[%s2805_s6] ss:$0 sm:$0xff] }
  0x5b   :  { %1925 = vmatprep.subr.bf16.mxu0 %v2401_v0 }
 0x10f   :  { %v152_v17 = vpop.f32.mrb[0].mxu0 }
 0x110   :  { %v153_v18 = vadd.f32 %v1630_v16, %v152_v17  ;;  %v1831_v19 = vpop.f32.mrb[1].mxu0 }
 0x111   :  { %v155_v20 = vpop.f32.mrb[2].mxu0 }
 0x112   :  { %v175_v21 = vmul.f32 0.5, %v153_v18  ;;  %v156_v22 = vadd.f32 %v1630_v16, %v155_v20  ;;  %v1832_v23 = vpop.f32.mrb[3].mxu0 }
 0x114   :  { %2194 = vtanh.f32 %v175_v21  ;;  %v176_v24 = vmul.f32 0.5, %v156_v22 }
 0x116   :  { %2196 = vtanh.f32 %v176_v24 }
 0x117   :  { %v160_v25 = vpop.f32.mrb[4].mxu0 }
 0x118   :  { %v161_v26 = vadd.f32 %v1630_v16, %v160_v25  ;;  %v1835_v27 = vpop.f32.mrb[5].mxu0 }
 0x119   :  { %v163_v28 = vpop.f32.mrb[6].mxu0 }
 0x11a   :  { %v177_v29 = vmul.f32 0.5, %v161_v26  ;;  %v164_v30 = vadd.f32 %v1630_v16, %v163_v28  ;;  %v1836_v31 = vpop.f32.mrb[7].mxu0 }
 0x11c   :  { %2198 = vtanh.f32 %v177_v29  ;;  %v178_v32 = vmul.f32 0.5, %v164_v30 }
 0x11e   :  { %v2195_v33 = vpop.eup %2194  ;;  %2200 = vtanh.f32 %v178_v32 }
 0x11f   :  { %v187_v34 = vadd.f32 1.0, %v2195_v33  ;;  %v168_v35 = vpop.f32.mrb[8].mxu0 }
 0x120   :  { %v2197_v36 = vpop.eup %2196  ;;  %v169_v37 = vadd.f32 %v1630_v16, %v168_v35  ;;  %v1839_v38 = vpop.f32.mrb[9].mxu0 }
 0x121   :  { %v188_v39 = vadd.f32 1.0, %v2197_v36  ;;  %v171_v40 = vpop.f32.mrb[10].mxu0  ;;  %v2546_v44 = vmul.f32 %v187_v34, %v175_v21 }
 0x122   :  { %v179_v41 = vmul.f32 0.5, %v169_v37  ;;  %v172_v42 = vadd.f32 %v1630_v16, %v171_v40  ;;  %v1840_v43 = vpop.f32.mrb[11].mxu0 }
 0x123   :  { %v2548_v45 = vmul.f32 %v188_v39, %v176_v24 }
 0x124   :  { %2202 = vtanh.f32 %v179_v41  ;;  %v180_v46 = vmul.f32 0.5, %v172_v42 }
 0x125   :  { %v199_v47 = vpack.c.bf16 %v2548_v45, %v2546_v44 }
 0x126   :  { %v2199_v48 = vpop.eup %2198  ;;  %2204 = vtanh.f32 %v180_v46 }
 0x127   :  { %v189_v49 = vadd.f32 1.0, %v2199_v48  ;;  %1858 = vmatmul.mubr.bf16.vlgmr.msra.gmra.mrb[0].mxu1 %v199_v47 }
 0x128   :  { %v2201_v50 = vpop.eup %2200  ;;  %1861 = vmatprep.mubr.msk.bf16.mxu1 %vm2402_vm0, %v2401_v0  ;;  %1898 = vmatpush3.bf16.msra.mxu1 %v2138_v5 }
 0x129   :  { %v190_v51 = vadd.f32 1.0, %v2201_v50  ;;  %v2554_v52 = vmul.f32 %v189_v49, %v177_v29  ;;  %1899 = vmatprep.subr.bf16.mxu1 %v2401_v0 }
 0x12b   :  { %v2556_v53 = vmul.f32 %v190_v51, %v178_v32 }
 0x12c   :  { %1900 = vmatpush3.bf16.msra.mxu1 %v2139_v6 }
 0x12d   :  { %v200_v54 = vpack.c.bf16 %v2556_v53, %v2554_v52  ;;  %1901 = vmatprep.subr.bf16.mxu1 %v2401_v0 }
 0x12e   :  { %v2203_v55 = vpop.eup %2202 }
 0x12f   :  { %v191_v56 = vadd.f32 1.0, %v2203_v55  ;;  %1862 = vmatmul.mubr.bf16.gmra.mrb[4].mxu1 %v200_v54 }
 0x130   :  { %v2205_v57 = vpop.eup %2204  ;;  %1865 = vmatprep.mubr.msk.bf16.mxu1 %vm2402_vm0, %v2401_v0 }
 0x131   :  { %v192_v58 = vadd.f32 1.0, %v2205_v57  ;;  %v2562_v59 = vmul.f32 %v191_v56, %v179_v41  ;;  %v2140_v57 = vld [vmem:[#allocation2 + $0x50] sm:$0xff]  }
 0x132   :  { %1902 = vmatpush3.bf16.msra.mxu1 %v2140_v57  ;;  %v2151_v57 = vld [vmem:[#allocation5 + $0x68] sm:$0xff]  }
 0x133   :  { %v2564_v60 = vmul.f32 %v192_v58, %v180_v46  ;;  %1903 = vmatprep.subr.bf16.mxu1 %v2401_v0  ;;  %v2141_v58 = vld [vmem:[#allocation2 + $0x58] sm:$0xff]  }
 0x135   :  { %v201_v61 = vpack.c.bf16 %v2564_v60, %v2562_v59 }
 0x136   :  { %1904 = vmatpush3.bf16.msra.mxu1 %v2141_v58  ;;  %v2152_v58 = vld [vmem:[#allocation5 + $0x70] sm:$0xff]  }
 0x137   :  { %1866 = vmatmul.mubr.bf16.gmra.mrb[8].mxu1 %v201_v61  ;;  %1905 = vmatprep.subr.bf16.mxu1 %v2401_v0  ;;  %v2142_v61 = vld [vmem:[#allocation2 + $0x60] sm:$0xff]  }
 0x138   :  { %1913 = vmatprep.mubr.msk.bf16.mxu1 %vm2402_vm0, %v2401_v0 }
 0x13a   :  { %1906 = vmatpush3.bf16.msra.mxu1 %v2142_v61  ;;  %v2153_v61 = vld [vmem:[#allocation5 + $0x78] sm:$0xff]  }
 0x13b   :  { %1907 = vmatprep.subr.bf16.mxu1 %v2401_v0 }
 0x13e   :  { %1908 = vmatpush3.bf16.msra.mxu1 %v2143_v62  ;;  %v2154_v62 = vld [vmem:[#allocation2 + $0x80] sm:$0xff]  }
 0x13f   :  { %1909 = vmatprep.subr.bf16.mxu1 %v2401_v0 }
 0x142   :  { %1910 = vmatpush3.bf16.msra.mxu1 %v2144_v63  ;;  %v2155_v63 = vld [vmem:[#allocation2 + $0x88] sm:$0xff]  }
 0x143   :  { %1911 = vmatprep.subr.bf16.mxu1 %v2401_v0 }
 0x146   :  { %1912 = vmatpush3.bf16.msra.mxu1 %v2145_v1  ;;  %v1656_v1 = vld [vmem:[%s2803_s4 + $0x1] ss:$0 sm:$0xff] }
 0x147   :  { %1953 = vmatprep.subr.bf16.mxu1 %v2401_v0 }
 0x1fa   :  { %v307_v8 = vpop.f32.mrb[0].mxu1 }
 0x1fb   :  { %v308_v9 = vadd.f32 %v1637_v7, %v307_v8  ;;  %v1859_v10 = vpop.f32.mrb[1].mxu1 }
 0x1fc   :  { %v310_v11 = vpop.f32.mrb[2].mxu1 }
 0x1fd   :  { %v330_v12 = vmul.f32 0.5, %v308_v9  ;;  %v311_v13 = vadd.f32 %v1637_v7, %v310_v11  ;;  %v1860_v14 = vpop.f32.mrb[3].mxu1 }
 0x1ff   :  { %2206 = vtanh.f32 %v330_v12  ;;  %v331_v15 = vmul.f32 0.5, %v311_v13 }
 0x201   :  { %2208 = vtanh.f32 %v331_v15 }
 0x202   :  { %v315_v16 = vpop.f32.mrb[4].mxu1 }
 0x203   :  { %v316_v17 = vadd.f32 %v1637_v7, %v315_v16  ;;  %v1863_v18 = vpop.f32.mrb[5].mxu1 }
 0x204   :  { %v318_v19 = vpop.f32.mrb[6].mxu1 }
 0x205   :  { %v332_v20 = vmul.f32 0.5, %v316_v17  ;;  %v319_v21 = vadd.f32 %v1637_v7, %v318_v19  ;;  %v1864_v22 = vpop.f32.mrb[7].mxu1 }
 0x207   :  { %2210 = vtanh.f32 %v332_v20  ;;  %v333_v23 = vmul.f32 0.5, %v319_v21 }
 0x209   :  { %v2207_v24 = vpop.eup %2206  ;;  %2212 = vtanh.f32 %v333_v23 }
 0x20a   :  { %v342_v25 = vadd.f32 1.0, %v2207_v24  ;;  %v323_v26 = vpop.f32.mrb[8].mxu1 }
 0x20b   :  { %v2209_v27 = vpop.eup %2208  ;;  %v324_v28 = vadd.f32 %v1637_v7, %v323_v26  ;;  %v1867_v29 = vpop.f32.mrb[9].mxu1 }
 0x20c   :  { %v343_v30 = vadd.f32 1.0, %v2209_v27  ;;  %v326_v31 = vpop.f32.mrb[10].mxu1  ;;  %v348_v35 = vmul.f32 %v342_v25, %v330_v12 }
 0x20d   :  { %v334_v32 = vmul.f32 0.5, %v324_v28  ;;  %v327_v33 = vadd.f32 %v1637_v7, %v326_v31  ;;  %v1868_v34 = vpop.f32.mrb[11].mxu1 }
 0x20e   :  { %v349_v36 = vmul.f32 %v343_v30, %v331_v15 }
 0x20f   :  { %2214 = vtanh.f32 %v334_v32  ;;  %v335_v37 = vmul.f32 0.5, %v327_v33 }
 0x210   :  { %v354_v38 = vpack.c.bf16 %v349_v36, %v348_v35 }
 0x211   :  { %v2211_v39 = vpop.eup %2210  ;;  %2216 = vtanh.f32 %v335_v37 }
 0x212   :  { %v344_v40 = vadd.f32 1.0, %v2211_v39  ;;  %1886 = vmatmul.mubr.bf16.vlgmr.msra.gmra.mrb[12].mxu0 %v354_v38 }
 0x213   :  { %v2213_v41 = vpop.eup %2212  ;;  %1889 = vmatprep.mubr.msk.bf16.mxu0 %vm2402_vm0, %v2401_v0  ;;  %1926 = vmatpush3.bf16.msra.mxu0 %v2146_v2 }
 0x214   :  { %v345_v42 = vadd.f32 1.0, %v2213_v41  ;;  %v350_v43 = vmul.f32 %v344_v40, %v332_v20  ;;  %1927 = vmatprep.subr.bf16.mxu0 %v2401_v0 }
 0x216   :  { %v351_v46 = vmul.f32 %v345_v42, %v333_v23 }
 0x217   :  { %1928 = vmatpush3.bf16.msra.mxu0 %v2147_v3 }
 0x218   :  { %v355_v47 = vpack.c.bf16 %v351_v46, %v350_v43  ;;  %1929 = vmatprep.subr.bf16.mxu0 %v2401_v0 }
 0x219   :  { %v2215_v48 = vpop.eup %2214 }
 0x21a   :  { %v346_v49 = vadd.f32 1.0, %v2215_v48  ;;  %1890 = vmatmul.mubr.bf16.gmra.mrb[16].mxu0 %v355_v47 }
 0x21b   :  { %v2217_v50 = vpop.eup %2216  ;;  %1893 = vmatprep.mubr.msk.bf16.mxu0 %vm2402_vm0, %v2401_v0 }
 0x21c   :  { %v347_v51 = vadd.f32 1.0, %v2217_v50  ;;  %v352_v54 = vmul.f32 %v346_v49, %v334_v32 }
 0x21e   :  { %v353_v55 = vmul.f32 %v347_v51, %v335_v37 }
 0x220   :  { %v356_v56 = vpack.c.bf16 %v353_v55, %v352_v54  ;;  %v2148_v54 = vld [vmem:[#allocation5 + $0x50] sm:$0xff]   ;;  %v2149_v55 = vld [vmem:[#allocation5 + $0x58] sm:$0xff]  }
 0x221   :  { %1930 = vmatpush3.bf16.msra.mxu0 %v2148_v54  ;;  %v2159_v54 = vld [vmem:[#allocation2 + $0xa8] sm:$0xff]  }
 0x222   :  { %1894 = vmatmul.mubr.bf16.gmra.mrb[20].mxu0 %v356_v56  ;;  %1931 = vmatprep.subr.bf16.mxu0 %v2401_v0  ;;  %v2150_v56 = vld [vmem:[#allocation5 + $0x60] sm:$0xff]  }
 0x223   :  { %1941 = vmatprep.mubr.msk.bf16.mxu0 %vm2402_vm0, %v2401_v0 }
 0x225   :  { %1932 = vmatpush3.bf16.msra.mxu0 %v2149_v55  ;;  %v2160_v55 = vld [vmem:[#allocation2 + $0xb0] sm:$0xff]  }
 0x226   :  { %1933 = vmatprep.subr.bf16.mxu0 %v2401_v0 }
 0x229   :  { %1934 = vmatpush3.bf16.msra.mxu0 %v2150_v56  ;;  %v2161_v56 = vld [vmem:[#allocation2 + $0xb8] sm:$0xff]  }
 0x22a   :  { %1935 = vmatprep.subr.bf16.mxu0 %v2401_v0 }
 0x22d   :  { %1936 = vmatpush3.bf16.msra.mxu0 %v2151_v57  ;;  %v2162_v57 = vld [vmem:[#allocation5 + $0x80] sm:$0xff]  }
 0x22e   :  { %1937 = vmatprep.subr.bf16.mxu0 %v2401_v0 }
 0x231   :  { %1938 = vmatpush3.bf16.msra.mxu0 %v2152_v58  ;;  %v2163_v58 = vld [vmem:[#allocation5 + $0x88] sm:$0xff]  }
 0x232   :  { %1939 = vmatprep.subr.bf16.mxu0 %v2401_v0 }
 0x235   :  { %1940 = vmatpush3.bf16.msra.mxu0 %v2153_v61  ;;  %v1666_v61 = vld [vmem:[%s2805_s6 + $0x1] ss:$0 sm:$0xff] }
 0x236   :  { %1981 = vmatprep.subr.bf16.mxu0 %v2401_v0 }
 0x2e5   :  { %v462_v5 = vpop.f32.mrb[12].mxu0 }
 0x2e6   :  { %v463_v6 = vadd.f32 %v1646_v4, %v462_v5  ;;  %v1887_v7 = vpop.f32.mrb[13].mxu0 }
 0x2e7   :  { %v465_v8 = vpop.f32.mrb[14].mxu0 }
 0x2e8   :  { %v485_v9 = vadd.f32 %v463_v6, %v2546_v44  ;;  %v466_v10 = vadd.f32 %v1646_v4, %v465_v8  ;;  %v1888_v11 = vpop.f32.mrb[15].mxu0 }
 0x2ea   :  { %v491_v12 = vmul.f32 0.5, %v485_v9  ;;  %v486_v13 = vadd.f32 %v466_v10, %v2548_v45 }
 0x2ec   :  { %2218 = vtanh.f32 %v491_v12  ;;  %v492_v14 = vmul.f32 0.5, %v486_v13 }
 0x2ed   :  { %v470_v15 = vpop.f32.mrb[16].mxu0 }
 0x2ee   :  { %2220 = vtanh.f32 %v492_v14  ;;  %v471_v16 = vadd.f32 %v1646_v4, %v470_v15  ;;  %v1891_v17 = vpop.f32.mrb[17].mxu0 }
 0x2ef   :  { %v473_v18 = vpop.f32.mrb[18].mxu0 }
 0x2f0   :  { %v487_v19 = vadd.f32 %v471_v16, %v2554_v52  ;;  %v474_v20 = vadd.f32 %v1646_v4, %v473_v18  ;;  %v1892_v21 = vpop.f32.mrb[19].mxu0 }
 0x2f2   :  { %v493_v22 = vmul.f32 0.5, %v487_v19  ;;  %v488_v23 = vadd.f32 %v474_v20, %v2556_v53 }
 0x2f4   :  { %2222 = vtanh.f32 %v493_v22  ;;  %v494_v44 = vmul.f32 0.5, %v488_v23 }
 0x2f5   :  { %v478_v24 = vpop.f32.mrb[20].mxu0 }
 0x2f6   :  { %v2219_v25 = vpop.eup %2218  ;;  %2224 = vtanh.f32 %v494_v44  ;;  %v479_v45 = vadd.f32 %v1646_v4, %v478_v24  ;;  %v1895_v26 = vpop.f32.mrb[21].mxu0 }
 0x2f7   :  { %v503_v27 = vadd.f32 1.0, %v2219_v25  ;;  %v481_v28 = vpop.f32.mrb[22].mxu0 }
 0x2f8   :  { %v2221_v29 = vpop.eup %2220  ;;  %v489_v30 = vadd.f32 %v479_v45, %v2562_v59  ;;  %v482_v31 = vadd.f32 %v1646_v4, %v481_v28  ;;  %v1896_v32 = vpop.f32.mrb[23].mxu0 }
 0x2f9   :  { %v504_v52 = vadd.f32 1.0, %v2221_v29  ;;  %v2604_v35 = vmul.f32 %v503_v27, %v491_v12 }
 0x2fa   :  { %v495_v33 = vmul.f32 0.5, %v489_v30  ;;  %v490_v34 = vadd.f32 %v482_v31, %v2564_v60 }
 0x2fb   :  { %v2606_v53 = vmul.f32 %v504_v52, %v492_v14 }
 0x2fc   :  { %2226 = vtanh.f32 %v495_v33  ;;  %v496_v36 = vmul.f32 0.5, %v490_v34 }
 0x2fd   :  { %v515_v37 = vpack.c.bf16 %v2606_v53, %v2604_v35 }
 0x2fe   :  { %v2223_v38 = vpop.eup %2222  ;;  %2228 = vtanh.f32 %v496_v36 }
 0x2ff   :  { %v505_v39 = vadd.f32 1.0, %v2223_v38  ;;  %1914 = vmatmul.mubr.bf16.vlgmr.msra.gmra.mrb[12].mxu1 %v515_v37 }
 0x300   :  { %v2225_v59 = vpop.eup %2224  ;;  %1917 = vmatprep.mubr.msk.bf16.mxu1 %vm2402_vm0, %v2401_v0  ;;  %1954 = vmatpush3.bf16.msra.mxu1 %v2154_v62 }
 0x301   :  { %v506_v40 = vadd.f32 1.0, %v2225_v59  ;;  %v2612_v41 = vmul.f32 %v505_v39, %v493_v22  ;;  %1955 = vmatprep.subr.bf16.mxu1 %v2401_v0 }
 0x303   :  { %v2614_v60 = vmul.f32 %v506_v40, %v494_v44 }
 0x304   :  { %1956 = vmatpush3.bf16.msra.mxu1 %v2155_v63 }
 0x305   :  { %v516_v42 = vpack.c.bf16 %v2614_v60, %v2612_v41  ;;  %1957 = vmatprep.subr.bf16.mxu1 %v2401_v0 }
 0x306   :  { %v2227_v43 = vpop.eup %2226 }
 0x307   :  { %v507_v46 = vadd.f32 1.0, %v2227_v43  ;;  %1918 = vmatmul.mubr.bf16.gmra.mrb[16].mxu1 %v516_v42 }
 0x308   :  { %v2229_v47 = vpop.eup %2228  ;;  %1921 = vmatprep.mubr.msk.bf16.mxu1 %vm2402_vm0, %v2401_v0 }
 0x309   :  { %v508_v48 = vadd.f32 1.0, %v2229_v47  ;;  %v2620_v49 = vmul.f32 %v507_v46, %v495_v33  ;;  %v2156_v47 = vld [vmem:[#allocation2 + $0x90] sm:$0xff]  }
 0x30a   :  { %1958 = vmatpush3.bf16.msra.mxu1 %v2156_v47  ;;  %v2167_v47 = vld [vmem:[#allocation5 + $0xa8] sm:$0xff]  }
 0x30b   :  { %v2622_v50 = vmul.f32 %v508_v48, %v496_v36  ;;  %1959 = vmatprep.subr.bf16.mxu1 %v2401_v0  ;;  %v2157_v48 = vld [vmem:[#allocation2 + $0x98] sm:$0xff]  }
 0x30d   :  { %v517_v51 = vpack.c.bf16 %v2622_v50, %v2620_v49 }
 0x30e   :  { %1960 = vmatpush3.bf16.msra.mxu1 %v2157_v48  ;;  %v2168_v48 = vld [vmem:[#allocation5 + $0xb0] sm:$0xff]  }
 0x30f   :  { %1922 = vmatmul.mubr.bf16.gmra.mrb[20].mxu1 %v517_v51  ;;  %1961 = vmatprep.subr.bf16.mxu1 %v2401_v0  ;;  %v2158_v51 = vld [vmem:[#allocation2 + $0xa0] sm:$0xff]  }
 0x310   :  { %1969 = vmatprep.mubr.msk.bf16.mxu1 %vm2402_vm0, %v2401_v0 }
 0x312   :  { %1962 = vmatpush3.bf16.msra.mxu1 %v2158_v51  ;;  %v2169_v51 = vld [vmem:[#allocation5 + $0xb8] sm:$0xff]  }
 0x313   :  { %1963 = vmatprep.subr.bf16.mxu1 %v2401_v0 }
 0x316   :  { %1964 = vmatpush3.bf16.msra.mxu1 %v2159_v54  ;;  %v2170_v54 = vld [vmem:[#allocation2 + $0xc0] sm:$0xff]  }
 0x317   :  { %1965 = vmatprep.subr.bf16.mxu1 %v2401_v0 }
 0x31a   :  { %1966 = vmatpush3.bf16.msra.mxu1 %v2160_v55  ;;  %v2171_v55 = vld [vmem:[#allocation2 + $0xc8] sm:$0xff]  }
 0x31b   :  { %1967 = vmatprep.subr.bf16.mxu1 %v2401_v0 }
 0x31e   :  { %1968 = vmatpush3.bf16.msra.mxu1 %v2161_v56  ;;  %v1676_v56 = vld [vmem:[%s2803_s4 + $0x2] ss:$0 sm:$0xff] }
 0x31f   :  { %2009 = vmatprep.subr.bf16.mxu1 %v2401_v0 }
 0x3d2   :  { %v625_v2 = vpop.f32.mrb[12].mxu1 }
 0x3d3   :  { %v626_v3 = vadd.f32 %v1656_v1, %v625_v2  ;;  %v1915_v4 = vpop.f32.mrb[13].mxu1 }
 0x3d4   :  { %v628_v5 = vpop.f32.mrb[14].mxu1 }
 0x3d5   :  { %v648_v6 = vmul.f32 0.5, %v626_v3  ;;  %v629_v7 = vadd.f32 %v1656_v1, %v628_v5  ;;  %v1916_v8 = vpop.f32.mrb[15].mxu1 }
 0x3d7   :  { %2230 = vtanh.f32 %v648_v6  ;;  %v649_v9 = vmul.f32 0.5, %v629_v7 }
 0x3d9   :  { %2232 = vtanh.f32 %v649_v9 }
 0x3da   :  { %v633_v10 = vpop.f32.mrb[16].mxu1 }
 0x3db   :  { %v634_v11 = vadd.f32 %v1656_v1, %v633_v10  ;;  %v1919_v12 = vpop.f32.mrb[17].mxu1 }
 0x3dc   :  { %v636_v13 = vpop.f32.mrb[18].mxu1 }
 0x3dd   :  { %v650_v14 = vmul.f32 0.5, %v634_v11  ;;  %v637_v15 = vadd.f32 %v1656_v1, %v636_v13  ;;  %v1920_v16 = vpop.f32.mrb[19].mxu1 }
 0x3df   :  { %2234 = vtanh.f32 %v650_v14  ;;  %v651_v17 = vmul.f32 0.5, %v637_v15 }
 0x3e1   :  { %v2231_v18 = vpop.eup %2230  ;;  %2236 = vtanh.f32 %v651_v17 }
 0x3e2   :  { %v660_v19 = vadd.f32 1.0, %v2231_v18  ;;  %v641_v20 = vpop.f32.mrb[20].mxu1 }
 0x3e3   :  { %v2233_v21 = vpop.eup %2232  ;;  %v642_v22 = vadd.f32 %v1656_v1, %v641_v20  ;;  %v1923_v23 = vpop.f32.mrb[21].mxu1 }
 0x3e4   :  { %v661_v44 = vadd.f32 1.0, %v2233_v21  ;;  %v644_v24 = vpop.f32.mrb[22].mxu1  ;;  %v666_v27 = vmul.f32 %v660_v19, %v648_v6 }
 0x3e5   :  { %v652_v25 = vmul.f32 0.5, %v642_v22  ;;  %v645_v45 = vadd.f32 %v1656_v1, %v644_v24  ;;  %v1924_v26 = vpop.f32.mrb[23].mxu1 }
 0x3e6   :  { %v667_v28 = vmul.f32 %v661_v44, %v649_v9 }
 0x3e7   :  { %2238 = vtanh.f32 %v652_v25  ;;  %v653_v29 = vmul.f32 0.5, %v645_v45 }
 0x3e8   :  { %v672_v30 = vpack.c.bf16 %v667_v28, %v666_v27 }
 0x3e9   :  { %v2235_v31 = vpop.eup %2234  ;;  %2240 = vtanh.f32 %v653_v29 }
 0x3ea   :  { %v662_v32 = vadd.f32 1.0, %v2235_v31  ;;  %1942 = vmatmul.mubr.bf16.vlgmr.msra.gmra.mrb[24].mxu0 %v672_v30 }
 0x3eb   :  { %v2237_v52 = vpop.eup %2236  ;;  %1945 = vmatprep.mubr.msk.bf16.mxu0 %vm2402_vm0, %v2401_v0  ;;  %1982 = vmatpush3.bf16.msra.mxu0 %v2162_v57 }
 0x3ec   :  { %v663_v33 = vadd.f32 1.0, %v2237_v52  ;;  %v668_v34 = vmul.f32 %v662_v32, %v650_v14  ;;  %1983 = vmatprep.subr.bf16.mxu0 %v2401_v0 }
 0x3ee   :  { %v669_v36 = vmul.f32 %v663_v33, %v651_v17 }
 0x3ef   :  { %1984 = vmatpush3.bf16.msra.mxu0 %v2163_v58 }
 0x3f0   :  { %v673_v37 = vpack.c.bf16 %v669_v36, %v668_v34  ;;  %1985 = vmatprep.subr.bf16.mxu0 %v2401_v0 }
 0x3f1   :  { %v2239_v38 = vpop.eup %2238 }
 0x3f2   :  { %v664_v39 = vadd.f32 1.0, %v2239_v38  ;;  %1946 = vmatmul.mubr.bf16.gmra.mrb[28].mxu0 %v673_v37 }
 0x3f3   :  { %v2241_v59 = vpop.eup %2240  ;;  %1949 = vmatprep.mubr.msk.bf16.mxu0 %vm2402_vm0, %v2401_v0 }
 0x3f4   :  { %v665_v40 = vadd.f32 1.0, %v2241_v59  ;;  %v670_v42 = vmul.f32 %v664_v39, %v652_v25 }
 0x3f6   :  { %v671_v43 = vmul.f32 %v665_v40, %v653_v29 }
 0x3f8   :  { %v674_v46 = vpack.c.bf16 %v671_v43, %v670_v42  ;;  %v2164_v42 = vld [vmem:[#allocation5 + $0x90] sm:$0xff]   ;;  %v2165_v43 = vld [vmem:[#allocation5 + $0x98] sm:$0xff]  }
 0x3f9   :  { %1986 = vmatpush3.bf16.msra.mxu0 %v2164_v42  ;;  %v2175_v42 = vld [vmem:[#allocation2 + $0xe8] sm:$0xff]  }
 0x3fa   :  { %1950 = vmatmul.mubr.bf16.gmra.mrb[32].mxu0 %v674_v46  ;;  %1987 = vmatprep.subr.bf16.mxu0 %v2401_v0  ;;  %v2166_v46 = vld [vmem:[#allocation5 + $0xa0] sm:$0xff]  }
 0x3fb   :  { %1997 = vmatprep.mubr.msk.bf16.mxu0 %vm2402_vm0, %v2401_v0 }
 0x3fd   :  { %1988 = vmatpush3.bf16.msra.mxu0 %v2165_v43  ;;  %v2176_v43 = vld [vmem:[#allocation2 + $0xf0] sm:$0xff]  }
 0x3fe   :  { %1989 = vmatprep.subr.bf16.mxu0 %v2401_v0 }
 0x401   :  { %1990 = vmatpush3.bf16.msra.mxu0 %v2166_v46  ;;  %v2177_v46 = vld [vmem:[#allocation2 + $0xf8] sm:$0xff]  }
 0x402   :  { %1991 = vmatprep.subr.bf16.mxu0 %v2401_v0 }
 0x405   :  { %1992 = vmatpush3.bf16.msra.mxu0 %v2167_v47  ;;  %v2178_v47 = vld [vmem:[#allocation5 + $0xc0] sm:$0xff]  }
 0x406   :  { %1993 = vmatprep.subr.bf16.mxu0 %v2401_v0 }
 0x409   :  { %1994 = vmatpush3.bf16.msra.mxu0 %v2168_v48  ;;  %v2179_v48 = vld [vmem:[#allocation5 + $0xc8] sm:$0xff]  }
 0x40a   :  { %1995 = vmatprep.subr.bf16.mxu0 %v2401_v0 }
 0x40d   :  { %1996 = vmatpush3.bf16.msra.mxu0 %v2169_v51  ;;  %v1686_v51 = vld [vmem:[%s2805_s6 + $0x2] ss:$0 sm:$0xff] }
 0x40e   :  { %2037 = vmatprep.subr.bf16.mxu0 %v2401_v0 }
 0x4bd   :  { %v782_v62 = vpop.f32.mrb[24].mxu0 }
 0x4be   :  { %v783_v63 = vadd.f32 %v1666_v61, %v782_v62  ;;  %v1943_v1 = vpop.f32.mrb[25].mxu0 }
 0x4bf   :  { %v785_v2 = vpop.f32.mrb[26].mxu0 }
 0x4c0   :  { %v805_v3 = vadd.f32 %v783_v63, %v2604_v35  ;;  %v786_v4 = vadd.f32 %v1666_v61, %v785_v2  ;;  %v1944_v5 = vpop.f32.mrb[27].mxu0 }
 0x4c2   :  { %v811_v6 = vmul.f32 0.5, %v805_v3  ;;  %v806_v7 = vadd.f32 %v786_v4, %v2606_v53 }
 0x4c4   :  { %2242 = vtanh.f32 %v811_v6  ;;  %v812_v8 = vmul.f32 0.5, %v806_v7 }
 0x4c5   :  { %v790_v9 = vpop.f32.mrb[28].mxu0 }
 0x4c6   :  { %2244 = vtanh.f32 %v812_v8  ;;  %v791_v10 = vadd.f32 %v1666_v61, %v790_v9  ;;  %v1947_v11 = vpop.f32.mrb[29].mxu0 }
 0x4c7   :  { %v793_v12 = vpop.f32.mrb[30].mxu0 }
 0x4c8   :  { %v807_v13 = vadd.f32 %v791_v10, %v2612_v41  ;;  %v794_v14 = vadd.f32 %v1666_v61, %v793_v12  ;;  %v1948_v15 = vpop.f32.mrb[31].mxu0 }
 0x4ca   :  { %v813_v16 = vmul.f32 0.5, %v807_v13  ;;  %v808_v17 = vadd.f32 %v794_v14, %v2614_v60 }
 0x4cc   :  { %2246 = vtanh.f32 %v813_v16  ;;  %v814_v35 = vmul.f32 0.5, %v808_v17 }
 0x4cd   :  { %v798_v18 = vpop.f32.mrb[32].mxu0 }
 0x4ce   :  { %v2243_v19 = vpop.eup %2242  ;;  %2248 = vtanh.f32 %v814_v35  ;;  %v799_v53 = vadd.f32 %v1666_v61, %v798_v18  ;;  %v1951_v20 = vpop.f32.mrb[33].mxu0 }
 0x4cf   :  { %v823_v21 = vadd.f32 1.0, %v2243_v19  ;;  %v801_v22 = vpop.f32.mrb[34].mxu0 }
 0x4d0   :  { %v2245_v23 = vpop.eup %2244  ;;  %v809_v44 = vadd.f32 %v799_v53, %v2620_v49  ;;  %v802_v24 = vadd.f32 %v1666_v61, %v801_v22  ;;  %v1952_v25 = vpop.f32.mrb[35].mxu0 }
 0x4d1   :  { %v824_v41 = vadd.f32 1.0, %v2245_v23  ;;  %v2662_v27 = vmul.f32 %v823_v21, %v811_v6 }
 0x4d2   :  { %v815_v45 = vmul.f32 0.5, %v809_v44  ;;  %v810_v26 = vadd.f32 %v802_v24, %v2622_v50 }
 0x4d3   :  { %v2664_v60 = vmul.f32 %v824_v41, %v812_v8 }
 0x4d4   :  { %2250 = vtanh.f32 %v815_v45  ;;  %v816_v28 = vmul.f32 0.5, %v810_v26 }
 0x4d5   :  { %v835_v29 = vpack.c.bf16 %v2664_v60, %v2662_v27 }
 0x4d6   :  { %v2247_v30 = vpop.eup %2246  ;;  %2252 = vtanh.f32 %v816_v28 }
 0x4d7   :  { %v825_v31 = vadd.f32 1.0, %v2247_v30  ;;  %1970 = vmatmul.mubr.bf16.vlgmr.msra.gmra.mrb[24].mxu1 %v835_v29 }
 0x4d8   :  { %v2249_v49 = vpop.eup %2248  ;;  %1973 = vmatprep.mubr.msk.bf16.mxu1 %vm2402_vm0, %v2401_v0  ;;  %2010 = vmatpush3.bf16.msra.mxu1 %v2170_v54 }
 0x4d9   :  { %v826_v32 = vadd.f32 1.0, %v2249_v49  ;;  %v2670_v52 = vmul.f32 %v825_v31, %v813_v16  ;;  %2011 = vmatprep.subr.bf16.mxu1 %v2401_v0 }
 0x4db   :  { %v2672_v50 = vmul.f32 %v826_v32, %v814_v35 }
 0x4dc   :  { %2012 = vmatpush3.bf16.msra.mxu1 %v2171_v55 }
 0x4dd   :  { %v836_v33 = vpack.c.bf16 %v2672_v50, %v2670_v52  ;;  %2013 = vmatprep.subr.bf16.mxu1 %v2401_v0 }
 0x4de   :  { %v2251_v34 = vpop.eup %2250 }
 0x4df   :  { %v827_v36 = vadd.f32 1.0, %v2251_v34  ;;  %1974 = vmatmul.mubr.bf16.gmra.mrb[28].mxu1 %v836_v33 }
 0x4e0   :  { %v2253_v37 = vpop.eup %2252  ;;  %1977 = vmatprep.mubr.msk.bf16.mxu1 %vm2402_vm0, %v2401_v0 }
 0x4e1   :  { %v828_v38 = vadd.f32 1.0, %v2253_v37  ;;  %v2678_v39 = vmul.f32 %v827_v36, %v815_v45  ;;  %v2172_v37 = vld [vmem:[#allocation2 + $0xd0] sm:$0xff]  }
 0x4e2   :  { %2014 = vmatpush3.bf16.msra.mxu1 %v2172_v37  ;;  %v2183_v37 = vld [vmem:[#allocation5 + $0xe8] sm:$0xff]  }
 0x4e3   :  { %v2680_v59 = vmul.f32 %v828_v38, %v816_v28  ;;  %2015 = vmatprep.subr.bf16.mxu1 %v2401_v0  ;;  %v2173_v38 = vld [vmem:[#allocation2 + $0xd8] sm:$0xff]  }
 0x4e5   :  { %v837_v40 = vpack.c.bf16 %v2680_v59, %v2678_v39 }
 0x4e6   :  { %2016 = vmatpush3.bf16.msra.mxu1 %v2173_v38  ;;  %v2184_v38 = vld [vmem:[#allocation5 + $0xf0] sm:$0xff]  }
 0x4e7   :  { %1978 = vmatmul.mubr.bf16.gmra.mrb[32].mxu1 %v837_v40  ;;  %2017 = vmatprep.subr.bf16.mxu1 %v2401_v0  ;;  %v2174_v40 = vld [vmem:[#allocation2 + $0xe0] sm:$0xff]  }
 0x4e8   :  { %2025 = vmatprep.mubr.msk.bf16.mxu1 %vm2402_vm0, %v2401_v0 }
 0x4ea   :  { %2018 = vmatpush3.bf16.msra.mxu1 %v2174_v40  ;;  %v2185_v40 = vld [vmem:[#allocation5 + $0xf8] sm:$0xff]  }
 0x4eb   :  { %2019 = vmatprep.subr.bf16.mxu1 %v2401_v0 }
 0x4ee   :  { %2020 = vmatpush3.bf16.msra.mxu1 %v2175_v42  ;;  %v2186_v42 = vld [vmem:[#allocation7] sm:$0xff]  }
 0x4ef   :  { %2021 = vmatprep.subr.bf16.mxu1 %v2401_v0 }
 0x4f2   :  { %2022 = vmatpush3.bf16.msra.mxu1 %v2176_v43  ;;  %v2187_v43 = vld [vmem:[#allocation7 + $0x8] sm:$0xff]  }
 0x4f3   :  { %2023 = vmatprep.subr.bf16.mxu1 %v2401_v0 }
 0x4f6   :  { %2024 = vmatpush3.bf16.msra.mxu1 %v2177_v46  ;;  %v1696_v46 = vld [vmem:[%s2803_s4 + $0x3] ss:$0 sm:$0xff] }
 0x4f7   :  { %2093 = vmatprep.subr.bf16.mxu1 %v2401_v0 }
 0x5aa   :  { %v945_v57 = vpop.f32.mrb[24].mxu1 }
 0x5ab   :  { %v946_v58 = vadd.f32 %v1676_v56, %v945_v57  ;;  %v1971_v61 = vpop.f32.mrb[25].mxu1 }
 0x5ac   :  { %v948_v62 = vpop.f32.mrb[26].mxu1 }
 0x5ad   :  { %v968_v63 = vmul.f32 0.5, %v946_v58  ;;  %v949_v1 = vadd.f32 %v1676_v56, %v948_v62  ;;  %v1972_v2 = vpop.f32.mrb[27].mxu1 }
 0x5af   :  { %2254 = vtanh.f32 %v968_v63  ;;  %v969_v3 = vmul.f32 0.5, %v949_v1 }
 0x5b1   :  { %2256 = vtanh.f32 %v969_v3 }
 0x5b2   :  { %v953_v4 = vpop.f32.mrb[28].mxu1 }
 0x5b3   :  { %v954_v5 = vadd.f32 %v1676_v56, %v953_v4  ;;  %v1975_v6 = vpop.f32.mrb[29].mxu1 }
 0x5b4   :  { %v956_v7 = vpop.f32.mrb[30].mxu1 }
 0x5b5   :  { %v970_v8 = vmul.f32 0.5, %v954_v5  ;;  %v957_v9 = vadd.f32 %v1676_v56, %v956_v7  ;;  %v1976_v10 = vpop.f32.mrb[31].mxu1 }
 0x5b7   :  { %2258 = vtanh.f32 %v970_v8  ;;  %v971_v11 = vmul.f32 0.5, %v957_v9 }
 0x5b9   :  { %v2255_v12 = vpop.eup %2254  ;;  %2260 = vtanh.f32 %v971_v11 }
 0x5ba   :  { %v980_v13 = vadd.f32 1.0, %v2255_v12  ;;  %v961_v14 = vpop.f32.mrb[32].mxu1 }
 0x5bb   :  { %v2257_v15 = vpop.eup %2256  ;;  %v962_v16 = vadd.f32 %v1676_v56, %v961_v14  ;;  %v1979_v17 = vpop.f32.mrb[33].mxu1 }
 0x5bc   :  { %v981_v35 = vadd.f32 1.0, %v2257_v15  ;;  %v964_v18 = vpop.f32.mrb[34].mxu1  ;;  %v986_v21 = vmul.f32 %v980_v13, %v968_v63 }
 0x5bd   :  { %v972_v19 = vmul.f32 0.5, %v962_v16  ;;  %v965_v53 = vadd.f32 %v1676_v56, %v964_v18  ;;  %v1980_v20 = vpop.f32.mrb[35].mxu1 }
 0x5be   :  { %v987_v22 = vmul.f32 %v981_v35, %v969_v3 }
 0x5bf   :  { %2262 = vtanh.f32 %v972_v19  ;;  %v973_v23 = vmul.f32 0.5, %v965_v53 }
 0x5c0   :  { %v992_v44 = vpack.c.bf16 %v987_v22, %v986_v21 }
 0x5c1   :  { %v2259_v24 = vpop.eup %2258  ;;  %2264 = vtanh.f32 %v973_v23 }
 0x5c2   :  { %v982_v25 = vadd.f32 1.0, %v2259_v24  ;;  %1998 = vmatmul.mubr.bf16.vlgmr.msra.gmra.mrb[36].mxu0 %v992_v44 }
 0x5c3   :  { %v2261_v41 = vpop.eup %2260  ;;  %2001 = vmatprep.mubr.msk.bf16.mxu0 %vm2402_vm0, %v2401_v0  ;;  %2038 = vmatpush3.bf16.msra.mxu0 %v2178_v47 }
 0x5c4   :  { %v983_v45 = vadd.f32 1.0, %v2261_v41  ;;  %v988_v26 = vmul.f32 %v982_v25, %v970_v8  ;;  %2039 = vmatprep.subr.bf16.mxu0 %v2401_v0 }
 0x5c6   :  { %v989_v28 = vmul.f32 %v983_v45, %v971_v11 }
 0x5c7   :  { %2040 = vmatpush3.bf16.msra.mxu0 %v2179_v48 }
 0x5c8   :  { %v993_v29 = vpack.c.bf16 %v989_v28, %v988_v26  ;;  %2041 = vmatprep.subr.bf16.mxu0 %v2401_v0 }
 0x5c9   :  { %v2263_v30 = vpop.eup %2262 }
 0x5ca   :  { %v984_v31 = vadd.f32 1.0, %v2263_v30  ;;  %2002 = vmatmul.mubr.bf16.gmra.mrb[40].mxu0 %v993_v29 }
 0x5cb   :  { %v2265_v49 = vpop.eup %2264  ;;  %2005 = vmatprep.mubr.msk.bf16.mxu0 %vm2402_vm0, %v2401_v0 }
 0x5cc   :  { %v985_v32 = vadd.f32 1.0, %v2265_v49  ;;  %v990_v33 = vmul.f32 %v984_v31, %v972_v19 }
 0x5ce   :  { %v991_v34 = vmul.f32 %v985_v32, %v973_v23 }
 0x5d0   :  { %v994_v36 = vpack.c.bf16 %v991_v34, %v990_v33  ;;  %v2180_v33 = vld [vmem:[#allocation5 + $0xd0] sm:$0xff]   ;;  %v2181_v34 = vld [vmem:[#allocation5 + $0xd8] sm:$0xff]  }
 0x5d1   :  { %2042 = vmatpush3.bf16.msra.mxu0 %v2180_v33  ;;  %v2191_v33 = vld [vmem:[#allocation7 + $0x28] sm:$0xff]  }
 0x5d2   :  { %2006 = vmatmul.mubr.bf16.gmra.mrb[44].mxu0 %v994_v36  ;;  %2043 = vmatprep.subr.bf16.mxu0 %v2401_v0  ;;  %v2182_v36 = vld [vmem:[#allocation5 + $0xe0] sm:$0xff]  }
 0x5d3   :  { %2053 = vmatprep.mubr.msk.bf16.mxu0 %vm2402_vm0, %v2401_v0 }
 0x5d5   :  { %2044 = vmatpush3.bf16.msra.mxu0 %v2181_v34  ;;  %v2192_v34 = vld [vmem:[#allocation7 + $0x30] sm:$0xff]  }
 0x5d6   :  { %2045 = vmatprep.subr.bf16.mxu0 %v2401_v0 }
 0x5d9   :  { %2046 = vmatpush3.bf16.msra.mxu0 %v2182_v36  ;;  %v2193_v36 = vld [vmem:[#allocation7 + $0x38] sm:$0xff]  }
 0x5da   :  { %2047 = vmatprep.subr.bf16.mxu0 %v2401_v0 }
 0x5dd   :  { %2048 = vmatpush3.bf16.msra.mxu0 %v2183_v37  ;;  %v1706_v37 = vld [vmem:[%s2805_s6 + $0x3] ss:$0 sm:$0xff] }
 0x5de   :  { %2049 = vmatprep.subr.bf16.mxu0 %v2401_v0 }
 0x5e1   :  { %2050 = vmatpush3.bf16.msra.mxu0 %v2184_v38 }
 0x5e2   :  { %2051 = vmatprep.subr.bf16.mxu0 %v2401_v0 }
 0x5e5   :  { %2052 = vmatpush3.bf16.msra.mxu0 %v2185_v40 }
 0x5e6   :  { %2065 = vmatprep.subr.bf16.mxu0 %v2401_v0 }
 0x695   :  { %v1102_v54 = vpop.f32.mrb[36].mxu0 }
 0x696   :  { %v1103_v55 = vadd.f32 %v1686_v51, %v1102_v54  ;;  %v1999_v56 = vpop.f32.mrb[37].mxu0 }
 0x697   :  { %v1105_v57 = vpop.f32.mrb[38].mxu0 }
 0x698   :  { %v1125_v58 = vadd.f32 %v1103_v55, %v2662_v27  ;;  %v1106_v61 = vadd.f32 %v1686_v51, %v1105_v57  ;;  %v2000_v62 = vpop.f32.mrb[39].mxu0 }
 0x69a   :  { %v1131_v63 = vmul.f32 0.5, %v1125_v58  ;;  %v1126_v1 = vadd.f32 %v1106_v61, %v2664_v60 }
 0x69c   :  { %2266 = vtanh.f32 %v1131_v63  ;;  %v1132_v2 = vmul.f32 0.5, %v1126_v1 }
 0x69d   :  { %v1110_v3 = vpop.f32.mrb[40].mxu0 }
 0x69e   :  { %2268 = vtanh.f32 %v1132_v2  ;;  %v1111_v4 = vadd.f32 %v1686_v51, %v1110_v3  ;;  %v2003_v5 = vpop.f32.mrb[41].mxu0 }
 0x69f   :  { %v1113_v6 = vpop.f32.mrb[42].mxu0 }
 0x6a0   :  { %v1127_v7 = vadd.f32 %v1111_v4, %v2670_v52  ;;  %v1114_v8 = vadd.f32 %v1686_v51, %v1113_v6  ;;  %v2004_v9 = vpop.f32.mrb[43].mxu0 }
 0x6a2   :  { %v1133_v10 = vmul.f32 0.5, %v1127_v7  ;;  %v1128_v11 = vadd.f32 %v1114_v8, %v2672_v50 }
 0x6a4   :  { %2270 = vtanh.f32 %v1133_v10  ;;  %v1134_v27 = vmul.f32 0.5, %v1128_v11 }
 0x6a5   :  { %v1118_v12 = vpop.f32.mrb[44].mxu0 }
 0x6a6   :  { %v2267_v13 = vpop.eup %2266  ;;  %2272 = vtanh.f32 %v1134_v27  ;;  %v1119_v60 = vadd.f32 %v1686_v51, %v1118_v12  ;;  %v2007_v14 = vpop.f32.mrb[45].mxu0 }
 0x6a7   :  { %v1143_v15 = vadd.f32 1.0, %v2267_v13  ;;  %v1121_v16 = vpop.f32.mrb[46].mxu0 }
 0x6a8   :  { %v2269_v17 = vpop.eup %2268  ;;  %v1129_v35 = vadd.f32 %v1119_v60, %v2678_v39  ;;  %v1122_v18 = vadd.f32 %v1686_v51, %v1121_v16  ;;  %v2008_v19 = vpop.f32.mrb[47].mxu0 }
 0x6a9   :  { %v1144_v52 = vadd.f32 1.0, %v2269_v17  ;;  %v2720_v21 = vmul.f32 %v1143_v15, %v1131_v63 }
 0x6aa   :  { %v1135_v53 = vmul.f32 0.5, %v1129_v35  ;;  %v1130_v20 = vadd.f32 %v1122_v18, %v2680_v59 }
 0x6ab   :  { %v2722_v50 = vmul.f32 %v1144_v52, %v1132_v2 }
 0x6ac   :  { %2274 = vtanh.f32 %v1135_v53  ;;  %v1136_v22 = vmul.f32 0.5, %v1130_v20 }
 0x6ad   :  { %v1155_v23 = vpack.c.bf16 %v2722_v50, %v2720_v21 }
 0x6ae   :  { %v2271_v44 = vpop.eup %2270  ;;  %2276 = vtanh.f32 %v1136_v22 }
 0x6af   :  { %v1145_v24 = vadd.f32 1.0, %v2271_v44  ;;  %2026 = vmatmul.mubr.bf16.vlgmr.msra.gmra.mrb[36].mxu1 %v1155_v23 }
 0x6b0   :  { %v2273_v39 = vpop.eup %2272  ;;  %2029 = vmatprep.mubr.msk.bf16.mxu1 %vm2402_vm0, %v2401_v0  ;;  %2101 = vmatpush3.bf16.msra.mxu1 %v2186_v42 }
 0x6b1   :  { %v1146_v25 = vadd.f32 1.0, %v2273_v39  ;;  %v2728_v41 = vmul.f32 %v1145_v24, %v1133_v10  ;;  %2094 = vmatprep.subr.bf16.mxu1 %v2401_v0 }
 0x6b3   :  { %v2730_v59 = vmul.f32 %v1146_v25, %v1134_v27 }
 0x6b4   :  { %2102 = vmatpush3.bf16.msra.mxu1 %v2187_v43 }
 0x6b5   :  { %v1156_v45 = vpack.c.bf16 %v2730_v59, %v2728_v41  ;;  %2095 = vmatprep.subr.bf16.mxu1 %v2401_v0 }
 0x6b6   :  { %v2275_v26 = vpop.eup %2274 }
 0x6b7   :  { %v1147_v28 = vadd.f32 1.0, %v2275_v26  ;;  %2030 = vmatmul.mubr.bf16.gmra.mrb[40].mxu1 %v1156_v45 }
 0x6b8   :  { %v2277_v29 = vpop.eup %2276  ;;  %2033 = vmatprep.mubr.msk.bf16.mxu1 %vm2402_vm0, %v2401_v0 }
 0x6b9   :  { %v1148_v30 = vadd.f32 1.0, %v2277_v29  ;;  %v2736_v31 = vmul.f32 %v1147_v28, %v1135_v53  ;;  %v2188_v29 = vld [vmem:[#allocation7 + $0x10] sm:$0xff]  }
 0x6ba   :  { %2103 = vmatpush3.bf16.msra.mxu1 %v2188_v29 }
 0x6bb   :  { %v2738_v49 = vmul.f32 %v1148_v30, %v1136_v22  ;;  %2096 = vmatprep.subr.bf16.mxu1 %v2401_v0  ;;  %v2189_v30 = vld [vmem:[#allocation7 + $0x18] sm:$0xff]  }
 0x6bd   :  { %v1157_v32 = vpack.c.bf16 %v2738_v49, %v2736_v31 }
 0x6be   :  { %2104 = vmatpush3.bf16.msra.mxu1 %v2189_v30 }
 0x6bf   :  { %2034 = vmatmul.mubr.bf16.gmra.mrb[44].mxu1 %v1157_v32  ;;  %2097 = vmatprep.subr.bf16.mxu1 %v2401_v0  ;;  %v2190_v32 = vld [vmem:[#allocation7 + $0x20] sm:$0xff]  }
 0x6c0   :  { %2085 = vmatprep.mubr.msk.bf16.mxu1 %vm2402_vm0, %v2401_v0 }
 0x6c2   :  { %2105 = vmatpush3.bf16.msra.mxu1 %v2190_v32 }
 0x6c3   :  { %2098 = vmatprep.subr.bf16.mxu1 %v2401_v0 }
 0x6c6   :  { %2106 = vmatpush3.bf16.msra.mxu1 %v2191_v33 }
 0x6c7   :  { %2099 = vmatprep.subr.bf16.mxu1 %v2401_v0 }
 0x6ca   :  { %2107 = vmatpush3.bf16.msra.mxu1 %v2192_v34 }
 0x6cb   :  { %2100 = vmatprep.subr.bf16.mxu1 %v2401_v0 }
 0x6ce   :  { %2108 = vmatpush3.bf16.msra.mxu1 %v2193_v36 }
 0x782   :  { %v1265_v47 = vpop.f32.mrb[36].mxu1 }
 0x783   :  { %v1266_v48 = vadd.f32 %v1696_v46, %v1265_v47  ;;  %v2027_v51 = vpop.f32.mrb[37].mxu1 }
 0x784   :  { %v1268_v54 = vpop.f32.mrb[38].mxu1 }
 0x785   :  { %v1288_v55 = vmul.f32 0.5, %v1266_v48  ;;  %v1269_v56 = vadd.f32 %v1696_v46, %v1268_v54  ;;  %v2028_v57 = vpop.f32.mrb[39].mxu1 }
 0x787   :  { %2278 = vtanh.f32 %v1288_v55  ;;  %v1289_v58 = vmul.f32 0.5, %v1269_v56 }
 0x789   :  { %2280 = vtanh.f32 %v1289_v58 }
 0x78a   :  { %v1273_v61 = vpop.f32.mrb[40].mxu1 }
 0x78b   :  { %v1274_v62 = vadd.f32 %v1696_v46, %v1273_v61  ;;  %v2031_v63 = vpop.f32.mrb[41].mxu1 }
 0x78c   :  { %v1276_v1 = vpop.f32.mrb[42].mxu1 }
 0x78d   :  { %v1290_v2 = vmul.f32 0.5, %v1274_v62  ;;  %v1277_v3 = vadd.f32 %v1696_v46, %v1276_v1  ;;  %v2032_v4 = vpop.f32.mrb[43].mxu1 }
 0x78f   :  { %2282 = vtanh.f32 %v1290_v2  ;;  %v1291_v5 = vmul.f32 0.5, %v1277_v3 }
 0x791   :  { %v2279_v6 = vpop.eup %2278  ;;  %2284 = vtanh.f32 %v1291_v5 }
 0x792   :  { %v1300_v7 = vadd.f32 1.0, %v2279_v6  ;;  %v1281_v8 = vpop.f32.mrb[44].mxu1 }
 0x793   :  { %v2281_v9 = vpop.eup %2280  ;;  %v1282_v10 = vadd.f32 %v1696_v46, %v1281_v8  ;;  %v2035_v11 = vpop.f32.mrb[45].mxu1 }
 0x794   :  { %v1301_v27 = vadd.f32 1.0, %v2281_v9  ;;  %v1284_v12 = vpop.f32.mrb[46].mxu1  ;;  %v1306_v15 = vmul.f32 %v1300_v7, %v1288_v55 }
 0x795   :  { %v1292_v13 = vmul.f32 0.5, %v1282_v10  ;;  %v1285_v60 = vadd.f32 %v1696_v46, %v1284_v12  ;;  %v2036_v14 = vpop.f32.mrb[47].mxu1 }
 0x796   :  { %v1307_v16 = vmul.f32 %v1301_v27, %v1289_v58 }
 0x797   :  { %2286 = vtanh.f32 %v1292_v13  ;;  %v1293_v17 = vmul.f32 0.5, %v1285_v60 }
 0x798   :  { %v1312_v35 = vpack.c.bf16 %v1307_v16, %v1306_v15 }
 0x799   :  { %v2283_v18 = vpop.eup %2282  ;;  %2288 = vtanh.f32 %v1293_v17 }
 0x79a   :  { %v1302_v19 = vadd.f32 1.0, %v2283_v18  ;;  %2054 = vmatmul.mubr.bf16.vlgmr.msra.gmra.mrb[48].mxu0 %v1312_v35 }
 0x79b   :  { %v2285_v52 = vpop.eup %2284  ;;  %2057 = vmatprep.mubr.msk.bf16.mxu0 %vm2402_vm0, %v2401_v0  ;;  %2066 = vmatpush3.bf16.msra.mxu0 %v2186_v42 }
 0x79c   :  { %v1303_v53 = vadd.f32 1.0, %v2285_v52  ;;  %2067 = vmatprep.subr.bf16.mxu0 %v2401_v0  ;;  %v1308_v20 = vmul.f32 %v1302_v19, %v1290_v2 }
 0x79e   :  { %v1309_v22 = vmul.f32 %v1303_v53, %v1291_v5 }
 0x79f   :  { %2068 = vmatpush3.bf16.msra.mxu0 %v2187_v43 }
 0x7a0   :  { %v1313_v23 = vpack.c.bf16 %v1309_v22, %v1308_v20  ;;  %2069 = vmatprep.subr.bf16.mxu0 %v2401_v0 }
 0x7a1   :  { %v2287_v44 = vpop.eup %2286 }
 0x7a2   :  { %v1304_v24 = vadd.f32 1.0, %v2287_v44  ;;  %2058 = vmatmul.mubr.bf16.gmra.mrb[52].mxu0 %v1313_v23 }
 0x7a3   :  { %v2289_v39 = vpop.eup %2288  ;;  %2061 = vmatprep.mubr.msk.bf16.mxu0 %vm2402_vm0, %v2401_v0  ;;  %2070 = vmatpush3.bf16.msra.mxu0 %v2188_v29 }
 0x7a4   :  { %v1305_v25 = vadd.f32 1.0, %v2289_v39  ;;  %v1310_v45 = vmul.f32 %v1304_v24, %v1292_v13  ;;  %2071 = vmatprep.subr.bf16.mxu0 %v2401_v0  ;;  %v1715_v39 = vld [vmem:[%s2807_s8] ss:$0 sm:$0xff]  ;;  %s2368_s8 = scalar_lea.vmem %s1618_s26, 768 }
 0x7a5   :  { %p2369_p10 = scmp.ne.s32.totalorder %s1618_s26, %s2368_s8  ;;  %p2374_p12 = scmp.lt.s32.totalorder %s2368_s8, %s2368_s8 }
 0x7a6   :  { %v1311_v26 = vmul.f32 %v1305_v25, %v1293_v17 }
 0x7a7   :  { %2072 = vmatpush3.bf16.msra.mxu0 %v2189_v30  ;;  %p2375_p13 = por %p2374_p12, %p2373_p11 }
 0x7a8   :  { %v1314_v28 = vpack.c.bf16 %v1311_v26, %v1310_v45  ;;  %2073 = vmatprep.subr.bf16.mxu0 %v2401_v0 }
 0x7a9   :  { %p2376_p0 = pnand %p2375_p13, %p2369_p10 }
 0x7aa   :  { %2062 = vmatmul.mubr.bf16.gmra.mrb[56].mxu0 %v1314_v28 }
 0x7ab   :  { %2081 = vmatprep.mubr.msk.bf16.mxu0 %vm2402_vm0, %v2401_v0  ;;  %2074 = vmatpush3.bf16.msra.mxu0 %v2190_v32 }
 0x7ac   :  { %2075 = vmatprep.subr.bf16.mxu0 %v2401_v0 }
 0x7af   :  { %2076 = vmatpush3.bf16.msra.mxu0 %v2191_v33 }
 0x7b0   :  { %2077 = vmatprep.subr.bf16.mxu0 %v2401_v0 }
 0x7b3   :  { %2078 = vmatpush3.bf16.msra.mxu0 %v2192_v34 }
 0x7b4   :  { %2079 = vmatprep.subr.bf16.mxu0 %v2401_v0 }
 0x7b7   :  { %2080 = vmatpush3.bf16.msra.mxu0 %v2193_v36 }
 0x86d   :  { %v1422_v38 = vpop.f32.mrb[48].mxu0 }
 0x86e   :  { %v1423_v40 = vadd.f32 %v1706_v37, %v1422_v38  ;;  %v2055_v42 = vpop.f32.mrb[49].mxu0 }
 0x86f   :  { %v1425_v43 = vpop.f32.mrb[50].mxu0 }
 0x870   :  { %v1445_v46 = vadd.f32 %v1423_v40, %v2720_v21  ;;  %v1426_v47 = vadd.f32 %v1706_v37, %v1425_v43  ;;  %v2056_v48 = vpop.f32.mrb[51].mxu0 }
 0x872   :  { %v1451_v51 = vmul.f32 0.5, %v1445_v46  ;;  %v1446_v54 = vadd.f32 %v1426_v47, %v2722_v50 }
 0x874   :  { %2290 = vtanh.f32 %v1451_v51  ;;  %v1452_v55 = vmul.f32 0.5, %v1446_v54 }
 0x875   :  { %v1430_v56 = vpop.f32.mrb[52].mxu0 }
 0x876   :  { %2292 = vtanh.f32 %v1452_v55  ;;  %v1431_v57 = vadd.f32 %v1706_v37, %v1430_v56  ;;  %v2059_v58 = vpop.f32.mrb[53].mxu0 }
 0x877   :  { %v1433_v61 = vpop.f32.mrb[54].mxu0 }
 0x878   :  { %v1447_v62 = vadd.f32 %v1431_v57, %v2728_v41  ;;  %v1434_v63 = vadd.f32 %v1706_v37, %v1433_v61  ;;  %v2060_v1 = vpop.f32.mrb[55].mxu0 }
 0x87a   :  { %v1453_v2 = vmul.f32 0.5, %v1447_v62  ;;  %v1448_v3 = vadd.f32 %v1434_v63, %v2730_v59 }
 0x87c   :  { %2294 = vtanh.f32 %v1453_v2  ;;  %v1454_v21 = vmul.f32 0.5, %v1448_v3 }
 0x87d   :  { %v1438_v4 = vpop.f32.mrb[56].mxu0 }
 0x87e   :  { %v2291_v5 = vpop.eup %2290  ;;  %2296 = vtanh.f32 %v1454_v21  ;;  %v1439_v50 = vadd.f32 %v1706_v37, %v1438_v4  ;;  %v2063_v6 = vpop.f32.mrb[57].mxu0 }
 0x87f   :  { %v1463_v7 = vadd.f32 1.0, %v2291_v5  ;;  %v1441_v8 = vpop.f32.mrb[58].mxu0 }
 0x880   :  { %v2293_v9 = vpop.eup %2292  ;;  %v1449_v10 = vadd.f32 %v1439_v50, %v2736_v31  ;;  %v1442_v11 = vadd.f32 %v1706_v37, %v1441_v8  ;;  %v2064_v27 = vpop.f32.mrb[59].mxu0 }
 0x881   :  { %v1464_v41 = vadd.f32 1.0, %v2293_v9  ;;  %v1469_v60 = vmul.f32 %v1463_v7, %v1451_v51 }
 0x882   :  { %v1455_v12 = vmul.f32 0.5, %v1449_v10  ;;  %v1450_v13 = vadd.f32 %v1442_v11, %v2738_v49 }
 0x883   :  { %v1470_v59 = vmul.f32 %v1464_v41, %v1452_v55 }
 0x884   :  { %2298 = vtanh.f32 %v1455_v12  ;;  %v1456_v14 = vmul.f32 0.5, %v1450_v13 }
 0x885   :  { %v1475_v15 = vpack.c.bf16 %v1470_v59, %v1469_v60 }
 0x886   :  { %v2295_v16 = vpop.eup %2294  ;;  %2300 = vtanh.f32 %v1456_v14 }
 0x887   :  { %v1465_v17 = vadd.f32 1.0, %v2295_v16  ;;  %2082 = vmatmul.mubr.bf16.vlgmr.msra.gmra.mrb[60].mxu0 %v1475_v15 }
 0x888   :  { %v2297_v35 = vpop.eup %2296 }
 0x889   :  { %v1466_v18 = vadd.f32 1.0, %v2297_v35  ;;  %v1471_v19 = vmul.f32 %v1465_v17, %v1453_v2 }
 0x88b   :  { %v1472_v52 = vmul.f32 %v1466_v18, %v1454_v21 }
 0x88d   :  { %v1476_v31 = vpack.c.bf16 %v1472_v52, %v1471_v19 }
 0x88e   :  { %v2299_v53 = vpop.eup %2298 }
 0x88f   :  { %v1467_v20 = vadd.f32 1.0, %v2299_v53  ;;  %2086 = vmatmul.mubr.bf16.vlgmr.msra.gmra.mrb[48].mxu1 %v1476_v31 }
 0x890   :  { %v2301_v22 = vpop.eup %2300  ;;  %2089 = vmatprep.mubr.msk.bf16.mxu1 %vm2402_vm0, %v2401_v0 }
 0x891   :  { %v1468_v49 = vadd.f32 1.0, %v2301_v22  ;;  %v1473_v23 = vmul.f32 %v1467_v20, %v1455_v12 }
 0x893   :  { %v1474_v44 = vmul.f32 %v1468_v49, %v1456_v14 }
 0x895   :  { %v1477_v24 = vpack.c.bf16 %v1474_v44, %v1473_v23 }
 0x897   :  { %2090 = vmatmul.mubr.bf16.gmra.mrb[52].mxu1 %v1477_v24 }
 0x95a   :  { %v1583_v25 = vpop.f32.mrb[60].mxu0 }
 0x95b   :  { %v1584_v45 = vadd.f32 %v1715_v39, %v1583_v25  ;;  %v2083_v26 = vpop.f32.mrb[61].mxu0 }
 0x95c   :  { %v1586_v28 = vpop.f32.mrb[62].mxu0 }
 0x95d   :  { %1606 = vst [vmem:[#allocation8] sm:$0xff] %v1584_v45  ;;  %v1587_v29 = vadd.f32 %v1715_v39, %v1586_v28  ;;  %v2084_v30 = vpop.f32.mrb[63].mxu0 }
 0x95f   :  { %1607 = vst [vmem:[#allocation8 + $0x8] sm:$0xff] %v1587_v29 }
 0x962   :  { %v1591_v32 = vpop.f32.mrb[48].mxu1 }
 0x963   :  { %v1592_v33 = vadd.f32 %v1715_v39, %v1591_v32  ;;  %v2087_v0 = vpop.f32.mrb[49].mxu1 }
 0x964   :  { %v1594_v34 = vpop.f32.mrb[50].mxu1 }
 0x965   :  { %1608 = vst [vmem:[#allocation8 + $0x10] sm:$0xff] %v1592_v33  ;;  %v1595_v36 = vadd.f32 %v1715_v39, %v1594_v34  ;;  %v2088_v37 = vpop.f32.mrb[51].mxu1 }
 0x967   :  { %1609 = vst [vmem:[#allocation8 + $0x18] sm:$0xff] %v1595_v36 }
 0x96a   :  { %v1599_v38 = vpop.f32.mrb[52].mxu1 }
 0x96b   :  { %v1600_v40 = vadd.f32 %v1715_v39, %v1599_v38  ;;  %v2091_v42 = vpop.f32.mrb[53].mxu1 }
 0x96c   :  { %v1602_v43 = vpop.f32.mrb[54].mxu1 }
 0x96d   :  { %1610 = vst [vmem:[#allocation8 + $0x20] sm:$0xff] %v1600_v40  ;;  %v1603_v46 = vadd.f32 %v1715_v39, %v1602_v43  ;;  %v2092_v47 = vpop.f32.mrb[55].mxu1 }
 0x96f   :  { %1611 = vst [vmem:[#allocation8 + $0x28] sm:$0xff] %v1603_v46 }
 0x970   :  { %2379 = shalt.err (!%p2376_p0)
}
 0x971   :  { %s2380_s21 = scalar_lea.hbm %s2808_s9, 768 }
 0x972   :  { %p2381_p1 = scmp.ne.s32.totalorder %s2808_s9, %s2380_s21  ;;  %p2384_p2 = scmp.lt.u32.totalorder %s2380_s21, %s2808_s9 }
 0x974   :  { %p2386_p3 = pnand %p2384_p2, %p2381_p1 }
 0x976   :  { %2389 = shalt.err (!%p2386_p3)
}
 0x977   :  { %s2404_s0 = smov 128   ;;  %s2405_s30 = smov 8  }
 0x978   :  { %1623 = dma.vmem_to_hbm [thread:$0]  %s1618_s26, 768, %s2808_s9, [#allocation4], %s2404_s0, %s2404_s0, %s2405_s30  }
 0x979   :  { %2394 = dma.done.wait [#allocation4], 768  }
 0x97a   :  { %2395 = vsyncadd [#allocation4], 4294966528 }
 0x97b   :  { %1627 = vsyncpa [#allocation3], 1 }
 0x97c   :  { %1628 = vsyncpa [#allocation6], 1 }
 0x97d   :  { %1629 = vsyncpa [#allocation4], 1 }

</bundles_post_ra>
